<compile_context>
chip_gen: v7x
topology: tpu7x:2x2x1
jax: 0.10.0
libtpu: 0.0.40
codegen_flags: <defaults>
</compile_context>

<pallas_src>
import functools
import math

import jax
import jax.numpy as jnp
from jax.experimental import pallas as pl
from jax.experimental.pallas import tpu as pltpu

F32 = jnp.float32
BF16 = jnp.bfloat16
LN_EPS = 1e-12          # BERT LayerNorm eps
NEG_INF = -1e9          # HF-style additive attention mask value


# ----------------------------------------------------------------------------
# In-kernel helpers (pure value math, all f32)
# ----------------------------------------------------------------------------
def _ln(x, g, b):
    mu = jnp.mean(x, axis=-1, keepdims=True)
    var = jnp.mean((x - mu) * (x - mu), axis=-1, keepdims=True)
    return (x - mu) * jax.lax.rsqrt(var + LN_EPS) * g + b


def _gelu_tanh(x):
    # TODO(synk): HF BERT default is exact erf-based GELU; tanh approximation is
    # used because erf is not guaranteed to lower in Mosaic.
    c = math.sqrt(2.0 / math.pi)
    return 0.5 * x * (1.0 + jnp.tanh(c * (x + 0.044715 * x * x * x)))


# ----------------------------------------------------------------------------
# Fused encoder kernel: one grid step == one batch element, all layers unrolled.
# ----------------------------------------------------------------------------
def _encoder_kernel(
    x_ref, mask_ref,
    emb_g_ref, emb_b_ref,
    wqkv_ref, bqkv_ref, wo_ref, bo_ref, ln1g_ref, ln1b_ref,
    w1_ref, b1_ref, w2_ref, b2_ref, ln2g_ref, ln2b_ref,
    fcw_ref, fcb_ref,
    out_ref,
    *, num_layers, num_heads, head_dim, hidden,
):
    S = x_ref.shape[1]

    # Embedding LayerNorm.
    x = _ln(x_ref[0], emb_g_ref[...], emb_b_ref[...])             # (S, H) f32

    # Additive key mask, broadcast to (S, S) ONCE and reused by every
    # head / layer (JAX does not CSE broadcast_in_dim).
    bias = jnp.broadcast_to((1.0 - mask_ref[0]) * NEG_INF, (S, S))

    for l in range(num_layers):
        # ---- fused QKV projection: MXU sees a single N = 3H matmul.
        # 1/sqrt(head_dim) is already folded into the Q columns / bias.
        qkv = jnp.dot(x.astype(BF16), wqkv_ref[l],
                      preferred_element_type=F32) + bqkv_ref[l]   # (S, 3H)

        ctx_heads = []
        for h in range(num_heads):
            lo = h * head_dim
            hi = lo + head_dim
            qh = qkv[:, lo:hi]                                    # (S, dh)
            kh = qkv[:, hidden + lo:hidden + hi]                  # (S, dh)
            vh = qkv[:, 2 * hidden + lo:2 * hidden + hi]          # (S, dh)

            # scores: contract the last axes directly (no explicit transpose);
            # scale already folded into Q.
            s = jax.lax.dot_general(
                qh.astype(BF16), kh.astype(BF16),
                (((1,), (1,)), ((), ())),
                preferred_element_type=F32) + bias                # (S, S)
            s = s - jnp.max(s, axis=-1, keepdims=True)
            p = jnp.exp(s)                                        # unnormalized
            denom = jnp.sum(p, axis=-1, keepdims=True)            # (S, 1)

            ctx = jnp.dot(p.astype(BF16), vh.astype(BF16),
                          preferred_element_type=F32)             # (S, dh)
            # deferred softmax normalization: divide (S,dh) instead of (S,S),
            # reciprocal goes to the EUP slot (free w.r.t. the VALU).
            ctx = ctx * pl.reciprocal(denom, approx=True)
            ctx_heads.append(ctx.astype(BF16))

        # merge heads once, then ONE full-K (S,H) @ (H,H) output projection.
        ctx_all = jnp.concatenate(ctx_heads, axis=-1)             # (S, H) bf16
        attn = jnp.dot(ctx_all, wo_ref[l],
                       preferred_element_type=F32) + bo_ref[l]    # (S, H)

        # residual + LayerNorm 1
        x = _ln(attn + x, ln1g_ref[l], ln1b_ref[l])

        # ---- FFN ----
        hdn = jnp.dot(x.astype(BF16), w1_ref[l],
                      preferred_element_type=F32) + b1_ref[l]     # (S, I)
        hdn = _gelu_tanh(hdn)
        ffn = jnp.dot(hdn.astype(BF16), w2_ref[l],
                      preferred_element_type=F32) + b2_ref[l]     # (S, H)

        # residual + LayerNorm 2
        x = _ln(ffn + x, ln2g_ref[l], ln2b_ref[l])

    # ---- vocab projection (lane-dense, vocab padded to a multiple of 128) ----
    out_ref[0] = jnp.dot(x.astype(BF16), fcw_ref[...],
                         preferred_element_type=F32) + fcb_ref[...]


# ----------------------------------------------------------------------------
# Parameters (deterministic synthetic init, BERT-style N(0, 0.02))
# Per-layer weights are stacked along a leading L axis; QKV weights are merged
# and the 1/sqrt(head_dim) score scale is pre-folded into the Q block.
# ----------------------------------------------------------------------------
def init_params(key, cfg):
    H, V, I = cfg["hidden"], cfg["vocab"], cfg["intermediate"]
    P, L, nh = cfg["max_pos"], cfg["layers"], cfg["heads"]
    dh = H // nh
    Vp = ((V + 127) // 128) * 128          # lane-dense padded vocab

    state = {"key": key}

    def normal(shape):
        state["key"], sub = jax.random.split(state["key"])
        return (0.02 * jax.random.normal(sub, shape)).astype(F32)

    fc_w = jnp.pad(normal((H, V)), ((0, 0), (0, Vp - V)))

    # merged QKV = concat(q_w, k_w, v_w) along the output axis; fold the
    # attention scale 1/sqrt(dh) into the Q weights (q-bias is zero so its
    # scaling is a no-op, but the same fold would apply to a real bias).
    scale = 1.0 / math.sqrt(dh)
    w_q, w_k, w_v = normal((L, H, H)), normal((L, H, H)), normal((L, H, H))
    w_qkv = jnp.concatenate([w_q * scale, w_k, w_v], axis=-1)

    params = {
        "word_emb": normal((V, H)),
        "pos_emb": normal((P, H)),
        "type_emb": normal((2, H)),
        "emb_ln_g": jnp.ones((1, H), F32),
        "emb_ln_b": jnp.zeros((1, H), F32),
        "w_qkv": w_qkv.astype(BF16),
        "b_qkv": jnp.zeros((L, 1, 3 * H), F32),
        "w_o": normal((L, H, H)).astype(BF16),
        "b_o": jnp.zeros((L, 1, H), F32),
        "ln1_g": jnp.ones((L, 1, H), F32),
        "ln1_b": jnp.zeros((L, 1, H), F32),
        "w1": normal((L, H, I)).astype(BF16),
        "b1": jnp.zeros((L, 1, I), F32),
        "w2": normal((L, I, H)).astype(BF16),
        "b2": jnp.zeros((L, 1, H), F32),
        "ln2_g": jnp.ones((L, 1, H), F32),
        "ln2_b": jnp.zeros((L, 1, H), F32),
        "fc_w": fc_w.astype(BF16),            # self.fc = nn.Linear(hidden, vocab)
        "fc_b": jnp.zeros((1, Vp), F32),
    }
    return params


# ----------------------------------------------------------------------------
# Forward pass: embeddings (XLA gather glue) -> fused Pallas encoder+fc kernel
# ----------------------------------------------------------------------------
def forward(params, input_ids, attention_mask, *, cfg):
    B, S = input_ids.shape
    H, nh, L = cfg["hidden"], cfg["heads"], cfg["layers"]
    I, V = cfg["intermediate"], cfg["vocab"]
    Vp = params["fc_w"].shape[1]
    dh = H // nh

    # Embedding gathers stay in XLA glue (single gather, token_type_ids = 0).
    # TODO(synk): token_type_ids hardcoded to 0, matching the reference usage.
    x_emb = (params["word_emb"][input_ids]
             + params["pos_emb"][jnp.arange(S)][None, :, :]
             + params["type_emb"][0][None, None, :]).astype(F32)      # (B, S, H)
    mask = attention_mask.astype(F32).reshape(B, 1, S)                # no per-head dup

    kern = functools.partial(_encoder_kernel, num_layers=L,
                             num_heads=nh, head_dim=dh, hidden=H)

    def wspec(shape):
        # Constant-index weight input: single-buffer it (the default
        # double-buffering only wastes VMEM for blocks that never change).
        return pl.BlockSpec(shape, lambda b, n=len(shape): (0,) * n,
                            pipeline_mode=pl.Buffered(buffer_count=1))

    logits_padded = pl.pallas_call(
        kern,
        grid=(B,),
        in_specs=[
            pl.BlockSpec((1, S, H), lambda b: (b, 0, 0)),   # x_emb
            pl.BlockSpec((1, 1, S), lambda b: (b, 0, 0)),   # mask
            wspec((1, H)), wspec((1, H)),                   # emb LN
            wspec((L, H, 3 * H)), wspec((L, 1, 3 * H)),     # merged QKV
            wspec((L, H, H)), wspec((L, 1, H)),             # attn out proj
            wspec((L, 1, H)), wspec((L, 1, H)),             # LN1
            wspec((L, H, I)), wspec((L, 1, I)),             # FFN W1
            wspec((L, I, H)), wspec((L, 1, H)),             # FFN W2
            wspec((L, 1, H)), wspec((L, 1, H)),             # LN2
            wspec((H, Vp)), wspec((1, Vp)),                 # fc
        ],
        out_specs=pl.BlockSpec((1, S, Vp), lambda b: (b, 0, 0)),
        out_shape=jax.ShapeDtypeStruct((B, S, Vp), F32),
        compiler_params=pltpu.CompilerParams(
            dimension_semantics=("parallel",),
            vmem_limit_bytes=64 * 1024 * 1024),
    )(x_emb, mask,
      params["emb_ln_g"], params["emb_ln_b"],
      params["w_qkv"], params["b_qkv"],
      params["w_o"], params["b_o"],
      params["ln1_g"], params["ln1_b"],
      params["w1"], params["b1"],
      params["w2"], params["b2"],
      params["ln2_g"], params["ln2_b"],
      params["fc_w"], params["fc_b"])

    return logits_padded[..., :V]


# ----------------------------------------------------------------------------
if __name__ == "__main__":
    cfg = dict(vocab=64, hidden=32, heads=2, layers=2, intermediate=64, max_pos=16)

    key = jax.random.PRNGKey(0)
    params = init_params(key, cfg)

    B, S = 2, 8
    id_key = jax.random.fold_in(key, 123)
    input_ids = jax.random.randint(id_key, (B, S), 0, cfg["vocab"], dtype=jnp.int32)
    attention_mask = jnp.array(
        [[1, 1, 1, 1, 1, 1, 1, 1],
         [1, 1, 1, 1, 1, 1, 0, 0]], dtype=jnp.int32)

    fwd = jax.jit(functools.partial(forward, cfg=cfg))
    logits = fwd(params, input_ids, attention_mask)
    jax.block_until_ready(logits)

    assert logits.shape == (B, S, cfg["vocab"]), logits.shape
    assert bool(jnp.all(jnp.isfinite(logits)))
    print("KERNEL_OK")
</pallas_src>

<mosaic_0001>
module attributes {stable_mosaic.version = 11 : i64} {
  func.func @_encoder_kernel(%arg0: i32, %arg1: memref<1x8x32xf32, #tpu.memory_space<vmem>>, %arg2: memref<1x1x8xf32, #tpu.memory_space<vmem>>, %arg3: memref<1x32xf32, #tpu.memory_space<vmem>>, %arg4: memref<1x32xf32, #tpu.memory_space<vmem>>, %arg5: memref<2x32x96xbf16, #tpu.memory_space<vmem>>, %arg6: memref<2x1x96xf32, #tpu.memory_space<vmem>>, %arg7: memref<2x32x32xbf16, #tpu.memory_space<vmem>>, %arg8: memref<2x1x32xf32, #tpu.memory_space<vmem>>, %arg9: memref<2x1x32xf32, #tpu.memory_space<vmem>>, %arg10: memref<2x1x32xf32, #tpu.memory_space<vmem>>, %arg11: memref<2x32x64xbf16, #tpu.memory_space<vmem>>, %arg12: memref<2x1x64xf32, #tpu.memory_space<vmem>>, %arg13: memref<2x64x32xbf16, #tpu.memory_space<vmem>>, %arg14: memref<2x1x32xf32, #tpu.memory_space<vmem>>, %arg15: memref<2x1x32xf32, #tpu.memory_space<vmem>>, %arg16: memref<2x1x32xf32, #tpu.memory_space<vmem>>, %arg17: memref<32x128xbf16, #tpu.memory_space<vmem>>, %arg18: memref<1x128xf32, #tpu.memory_space<vmem>>, %arg19: memref<1x8x128xf32, #tpu.memory_space<vmem>>) attributes {dimension_semantics = [#tpu.dimension_semantics<parallel>], iteration_bounds = array<i64: 2>, scalar_prefetch = 0 : i64, scratch_operands = 0 : i64, tpu.core_type = #tpu.core_type<tc>, window_params = [{transform_indices = @transform_0, window_bounds = array<i64: 1, 8, 32>}, {transform_indices = @transform_1, window_bounds = array<i64: 1, 1, 8>}, {pipeline_mode = #tpu.pipeline_mode<synchronous>, transform_indices = @transform_2, window_bounds = array<i64: 1, 32>}, {pipeline_mode = #tpu.pipeline_mode<synchronous>, transform_indices = @transform_3, window_bounds = array<i64: 1, 32>}, {pipeline_mode = #tpu.pipeline_mode<synchronous>, transform_indices = @transform_4, window_bounds = array<i64: 2, 32, 96>}, {pipeline_mode = #tpu.pipeline_mode<synchronous>, transform_indices = @transform_5, window_bounds = array<i64: 2, 1, 96>}, {pipeline_mode = #tpu.pipeline_mode<synchronous>, transform_indices = @transform_6, window_bounds = array<i64: 2, 32, 32>}, {pipeline_mode = #tpu.pipeline_mode<synchronous>, transform_indices = @transform_7, window_bounds = array<i64: 2, 1, 32>}, {pipeline_mode = #tpu.pipeline_mode<synchronous>, transform_indices = @transform_8, window_bounds = array<i64: 2, 1, 32>}, {pipeline_mode = #tpu.pipeline_mode<synchronous>, transform_indices = @transform_9, window_bounds = array<i64: 2, 1, 32>}, {pipeline_mode = #tpu.pipeline_mode<synchronous>, transform_indices = @transform_10, window_bounds = array<i64: 2, 32, 64>}, {pipeline_mode = #tpu.pipeline_mode<synchronous>, transform_indices = @transform_11, window_bounds = array<i64: 2, 1, 64>}, {pipeline_mode = #tpu.pipeline_mode<synchronous>, transform_indices = @transform_12, window_bounds = array<i64: 2, 64, 32>}, {pipeline_mode = #tpu.pipeline_mode<synchronous>, transform_indices = @transform_13, window_bounds = array<i64: 2, 1, 32>}, {pipeline_mode = #tpu.pipeline_mode<synchronous>, transform_indices = @transform_14, window_bounds = array<i64: 2, 1, 32>}, {pipeline_mode = #tpu.pipeline_mode<synchronous>, transform_indices = @transform_15, window_bounds = array<i64: 2, 1, 32>}, {pipeline_mode = #tpu.pipeline_mode<synchronous>, transform_indices = @transform_16, window_bounds = array<i64: 32, 128>}, {pipeline_mode = #tpu.pipeline_mode<synchronous>, transform_indices = @transform_17, window_bounds = array<i64: 1, 128>}, {transform_indices = @transform_18, window_bounds = array<i64: 1, 8, 128>}]} {
    %c0 = arith.constant 0 : index
    %c0_0 = arith.constant 0 : index
    %c0_1 = arith.constant 0 : index
    %0 = vector.load %arg1[%c0, %c0_0, %c0_1] : memref<1x8x32xf32, #tpu.memory_space<vmem>>, vector<1x8x32xf32>
    %1 = vector.shape_cast %0 : vector<1x8x32xf32> to vector<8x32xf32>
    %c0_2 = arith.constant 0 : index
    %c0_3 = arith.constant 0 : index
    %2 = vector.load %arg3[%c0_2, %c0_3] : memref<1x32xf32, #tpu.memory_space<vmem>>, vector<1x32xf32>
    %c0_4 = arith.constant 0 : index
    %c0_5 = arith.constant 0 : index
    %3 = vector.load %arg4[%c0_4, %c0_5] : memref<1x32xf32, #tpu.memory_space<vmem>>, vector<1x32xf32>
    %cst = arith.constant dense<0.000000e+00> : vector<8xf32>
    %4 = vector.multi_reduction <add>, %1, %cst [1] : vector<8x32xf32> to vector<8xf32>
    %5 = vector.shape_cast %4 : vector<8xf32> to vector<8x1xf32>
    %cst_6 = arith.constant 3.200000e+01 : f32
    %6 = vector.broadcast %cst_6 : f32 to vector<8x1xf32>
    %7 = arith.divf %5, %6 : vector<8x1xf32>
    %8 = vector.broadcast %7 : vector<8x1xf32> to vector<8x32xf32>
    %9 = arith.subf %1, %8 : vector<8x32xf32>
    %10 = vector.broadcast %7 : vector<8x1xf32> to vector<8x32xf32>
    %11 = arith.subf %1, %10 : vector<8x32xf32>
    %12 = arith.mulf %9, %11 : vector<8x32xf32>
    %cst_7 = arith.constant dense<0.000000e+00> : vector<8xf32>
    %13 = vector.multi_reduction <add>, %12, %cst_7 [1] : vector<8x32xf32> to vector<8xf32>
    %14 = vector.shape_cast %13 : vector<8xf32> to vector<8x1xf32>
    %cst_8 = arith.constant 3.200000e+01 : f32
    %15 = vector.broadcast %cst_8 : f32 to vector<8x1xf32>
    %16 = arith.divf %14, %15 : vector<8x1xf32>
    %17 = vector.broadcast %7 : vector<8x1xf32> to vector<8x32xf32>
    %18 = arith.subf %1, %17 : vector<8x32xf32>
    %cst_9 = arith.constant 9.99999996E-13 : f32
    %19 = vector.broadcast %cst_9 : f32 to vector<8x1xf32>
    %20 = arith.addf %16, %19 : vector<8x1xf32>
    %21 = math.rsqrt %20 : vector<8x1xf32>
    %22 = vector.broadcast %21 : vector<8x1xf32> to vector<8x32xf32>
    %23 = arith.mulf %18, %22 : vector<8x32xf32>
    %24 = vector.broadcast %2 : vector<1x32xf32> to vector<8x32xf32>
    %25 = arith.mulf %23, %24 : vector<8x32xf32>
    %26 = vector.broadcast %3 : vector<1x32xf32> to vector<8x32xf32>
    %27 = arith.addf %25, %26 : vector<8x32xf32>
    %c0_10 = arith.constant 0 : index
    %c0_11 = arith.constant 0 : index
    %c0_12 = arith.constant 0 : index
    %28 = vector.load %arg2[%c0_10, %c0_11, %c0_12] : memref<1x1x8xf32, #tpu.memory_space<vmem>>, vector<1x1x8xf32>
    %29 = vector.shape_cast %28 : vector<1x1x8xf32> to vector<1x8xf32>
    %cst_13 = arith.constant 1.000000e+00 : f32
    %30 = vector.broadcast %cst_13 : f32 to vector<1x8xf32>
    %31 = arith.subf %30, %29 : vector<1x8xf32>
    %cst_14 = arith.constant -1.000000e+09 : f32
    %32 = vector.broadcast %cst_14 : f32 to vector<1x8xf32>
    %33 = arith.mulf %31, %32 : vector<1x8xf32>
    %34 = vector.shape_cast %33 : vector<1x8xf32> to vector<1x8xf32>
    %35 = vector.broadcast %34 : vector<1x8xf32> to vector<8x8xf32>
    %36 = arith.truncf %27 : vector<8x32xf32> to vector<8x32xbf16>
    %c0_15 = arith.constant 0 : index
    %c0_16 = arith.constant 0 : index
    %c0_17 = arith.constant 0 : index
    %37 = vector.load %arg5[%c0_15, %c0_16, %c0_17] : memref<2x32x96xbf16, #tpu.memory_space<vmem>>, vector<1x32x96xbf16>
    %38 = vector.shape_cast %37 : vector<1x32x96xbf16> to vector<32x96xbf16>
    %cst_18 = arith.constant dense<0.000000e+00> : vector<8x96xf32>
    %39 = tpu.matmul %36, %38, %cst_18 {dimension_numbers = #tpu.dot_dimension_numbers<[1], [0], [0], [1], [0, 0, 1, 1], [], []>} : vector<8x32xbf16>, vector<32x96xbf16>, vector<8x96xf32> -> vector<8x96xf32>
    %c0_19 = arith.constant 0 : index
    %c0_20 = arith.constant 0 : index
    %c0_21 = arith.constant 0 : index
    %40 = vector.load %arg6[%c0_19, %c0_20, %c0_21] : memref<2x1x96xf32, #tpu.memory_space<vmem>>, vector<1x1x96xf32>
    %41 = vector.shape_cast %40 : vector<1x1x96xf32> to vector<1x96xf32>
    %42 = vector.broadcast %41 : vector<1x96xf32> to vector<8x96xf32>
    %43 = arith.addf %39, %42 : vector<8x96xf32>
    %44 = vector.extract_strided_slice %43 {offsets = [0, 0], sizes = [8, 16], strides = [1, 1]} : vector<8x96xf32> to vector<8x16xf32>
    %45 = vector.extract_strided_slice %43 {offsets = [0, 32], sizes = [8, 16], strides = [1, 1]} : vector<8x96xf32> to vector<8x16xf32>
    %46 = vector.extract_strided_slice %43 {offsets = [0, 64], sizes = [8, 16], strides = [1, 1]} : vector<8x96xf32> to vector<8x16xf32>
    %47 = arith.truncf %44 : vector<8x16xf32> to vector<8x16xbf16>
    %48 = arith.truncf %45 : vector<8x16xf32> to vector<8x16xbf16>
    %cst_22 = arith.constant dense<0.000000e+00> : vector<8x8xf32>
    %49 = tpu.matmul %47, %48, %cst_22 {dimension_numbers = #tpu.dot_dimension_numbers<[1], [1], [0], [0], [0, 0, 1, 0], [], []>} : vector<8x16xbf16>, vector<8x16xbf16>, vector<8x8xf32> -> vector<8x8xf32>
    %50 = arith.addf %49, %35 : vector<8x8xf32>
    %cst_23 = arith.constant dense<0xFF800000> : vector<8xf32>
    %51 = vector.multi_reduction <maximumf>, %50, %cst_23 [1] : vector<8x8xf32> to vector<8xf32>
    %52 = vector.shape_cast %51 : vector<8xf32> to vector<8x1xf32>
    %53 = vector.broadcast %52 : vector<8x1xf32> to vector<8x8xf32>
    %54 = arith.subf %50, %53 : vector<8x8xf32>
    %55 = math.exp %54 : vector<8x8xf32>
    %cst_24 = arith.constant dense<0.000000e+00> : vector<8xf32>
    %56 = vector.multi_reduction <add>, %55, %cst_24 [1] : vector<8x8xf32> to vector<8xf32>
    %57 = vector.shape_cast %56 : vector<8xf32> to vector<8x1xf32>
    %58 = arith.truncf %55 : vector<8x8xf32> to vector<8x8xbf16>
    %59 = arith.truncf %46 : vector<8x16xf32> to vector<8x16xbf16>
    %cst_25 = arith.constant dense<0.000000e+00> : vector<8x16xf32>
    %60 = tpu.matmul %58, %59, %cst_25 {dimension_numbers = #tpu.dot_dimension_numbers<[1], [0], [0], [1], [0, 0, 1, 1], [], []>} : vector<8x8xbf16>, vector<8x16xbf16>, vector<8x16xf32> -> vector<8x16xf32>
    %61 = tpu.reciprocal %57 {approx = true} : vector<8x1xf32> -> vector<8x1xf32>
    %62 = vector.broadcast %61 : vector<8x1xf32> to vector<8x16xf32>
    %63 = arith.mulf %60, %62 : vector<8x16xf32>
    %64 = arith.truncf %63 : vector<8x16xf32> to vector<8x16xbf16>
    %65 = vector.extract_strided_slice %43 {offsets = [0, 16], sizes = [8, 16], strides = [1, 1]} : vector<8x96xf32> to vector<8x16xf32>
    %66 = vector.extract_strided_slice %43 {offsets = [0, 48], sizes = [8, 16], strides = [1, 1]} : vector<8x96xf32> to vector<8x16xf32>
    %67 = vector.extract_strided_slice %43 {offsets = [0, 80], sizes = [8, 16], strides = [1, 1]} : vector<8x96xf32> to vector<8x16xf32>
    %68 = arith.truncf %65 : vector<8x16xf32> to vector<8x16xbf16>
    %69 = arith.truncf %66 : vector<8x16xf32> to vector<8x16xbf16>
    %cst_26 = arith.constant dense<0.000000e+00> : vector<8x8xf32>
    %70 = tpu.matmul %68, %69, %cst_26 {dimension_numbers = #tpu.dot_dimension_numbers<[1], [1], [0], [0], [0, 0, 1, 0], [], []>} : vector<8x16xbf16>, vector<8x16xbf16>, vector<8x8xf32> -> vector<8x8xf32>
    %71 = arith.addf %70, %35 : vector<8x8xf32>
    %cst_27 = arith.constant dense<0xFF800000> : vector<8xf32>
    %72 = vector.multi_reduction <maximumf>, %71, %cst_27 [1] : vector<8x8xf32> to vector<8xf32>
    %73 = vector.shape_cast %72 : vector<8xf32> to vector<8x1xf32>
    %74 = vector.broadcast %73 : vector<8x1xf32> to vector<8x8xf32>
    %75 = arith.subf %71, %74 : vector<8x8xf32>
    %76 = math.exp %75 : vector<8x8xf32>
    %cst_28 = arith.constant dense<0.000000e+00> : vector<8xf32>
    %77 = vector.multi_reduction <add>, %76, %cst_28 [1] : vector<8x8xf32> to vector<8xf32>
    %78 = vector.shape_cast %77 : vector<8xf32> to vector<8x1xf32>
    %79 = arith.truncf %76 : vector<8x8xf32> to vector<8x8xbf16>
    %80 = arith.truncf %67 : vector<8x16xf32> to vector<8x16xbf16>
    %cst_29 = arith.constant dense<0.000000e+00> : vector<8x16xf32>
    %81 = tpu.matmul %79, %80, %cst_29 {dimension_numbers = #tpu.dot_dimension_numbers<[1], [0], [0], [1], [0, 0, 1, 1], [], []>} : vector<8x8xbf16>, vector<8x16xbf16>, vector<8x16xf32> -> vector<8x16xf32>
    %82 = tpu.reciprocal %78 {approx = true} : vector<8x1xf32> -> vector<8x1xf32>
    %83 = vector.broadcast %82 : vector<8x1xf32> to vector<8x16xf32>
    %84 = arith.mulf %81, %83 : vector<8x16xf32>
    %85 = arith.truncf %84 : vector<8x16xf32> to vector<8x16xbf16>
    %86 = tpu.concatenate %64, %85 in 1 : vector<8x16xbf16>, vector<8x16xbf16> -> vector<8x32xbf16>
    %c0_30 = arith.constant 0 : index
    %c0_31 = arith.constant 0 : index
    %c0_32 = arith.constant 0 : index
    %87 = vector.load %arg7[%c0_30, %c0_31, %c0_32] : memref<2x32x32xbf16, #tpu.memory_space<vmem>>, vector<1x32x32xbf16>
    %88 = vector.shape_cast %87 : vector<1x32x32xbf16> to vector<32x32xbf16>
    %cst_33 = arith.constant dense<0.000000e+00> : vector<8x32xf32>
    %89 = tpu.matmul %86, %88, %cst_33 {dimension_numbers = #tpu.dot_dimension_numbers<[1], [0], [0], [1], [0, 0, 1, 1], [], []>} : vector<8x32xbf16>, vector<32x32xbf16>, vector<8x32xf32> -> vector<8x32xf32>
    %c0_34 = arith.constant 0 : index
    %c0_35 = arith.constant 0 : index
    %c0_36 = arith.constant 0 : index
    %90 = vector.load %arg8[%c0_34, %c0_35, %c0_36] : memref<2x1x32xf32, #tpu.memory_space<vmem>>, vector<1x1x32xf32>
    %91 = vector.shape_cast %90 : vector<1x1x32xf32> to vector<1x32xf32>
    %92 = vector.broadcast %91 : vector<1x32xf32> to vector<8x32xf32>
    %93 = arith.addf %89, %92 : vector<8x32xf32>
    %94 = arith.addf %93, %27 : vector<8x32xf32>
    %c0_37 = arith.constant 0 : index
    %c0_38 = arith.constant 0 : index
    %c0_39 = arith.constant 0 : index
    %95 = vector.load %arg9[%c0_37, %c0_38, %c0_39] : memref<2x1x32xf32, #tpu.memory_space<vmem>>, vector<1x1x32xf32>
    %96 = vector.shape_cast %95 : vector<1x1x32xf32> to vector<1x32xf32>
    %c0_40 = arith.constant 0 : index
    %c0_41 = arith.constant 0 : index
    %c0_42 = arith.constant 0 : index
    %97 = vector.load %arg10[%c0_40, %c0_41, %c0_42] : memref<2x1x32xf32, #tpu.memory_space<vmem>>, vector<1x1x32xf32>
    %98 = vector.shape_cast %97 : vector<1x1x32xf32> to vector<1x32xf32>
    %cst_43 = arith.constant dense<0.000000e+00> : vector<8xf32>
    %99 = vector.multi_reduction <add>, %94, %cst_43 [1] : vector<8x32xf32> to vector<8xf32>
    %100 = vector.shape_cast %99 : vector<8xf32> to vector<8x1xf32>
    %cst_44 = arith.constant 3.200000e+01 : f32
    %101 = vector.broadcast %cst_44 : f32 to vector<8x1xf32>
    %102 = arith.divf %100, %101 : vector<8x1xf32>
    %103 = vector.broadcast %102 : vector<8x1xf32> to vector<8x32xf32>
    %104 = arith.subf %94, %103 : vector<8x32xf32>
    %105 = vector.broadcast %102 : vector<8x1xf32> to vector<8x32xf32>
    %106 = arith.subf %94, %105 : vector<8x32xf32>
    %107 = arith.mulf %104, %106 : vector<8x32xf32>
    %cst_45 = arith.constant dense<0.000000e+00> : vector<8xf32>
    %108 = vector.multi_reduction <add>, %107, %cst_45 [1] : vector<8x32xf32> to vector<8xf32>
    %109 = vector.shape_cast %108 : vector<8xf32> to vector<8x1xf32>
    %cst_46 = arith.constant 3.200000e+01 : f32
    %110 = vector.broadcast %cst_46 : f32 to vector<8x1xf32>
    %111 = arith.divf %109, %110 : vector<8x1xf32>
    %112 = vector.broadcast %102 : vector<8x1xf32> to vector<8x32xf32>
    %113 = arith.subf %94, %112 : vector<8x32xf32>
    %cst_47 = arith.constant 9.99999996E-13 : f32
    %114 = vector.broadcast %cst_47 : f32 to vector<8x1xf32>
    %115 = arith.addf %111, %114 : vector<8x1xf32>
    %116 = math.rsqrt %115 : vector<8x1xf32>
    %117 = vector.broadcast %116 : vector<8x1xf32> to vector<8x32xf32>
    %118 = arith.mulf %113, %117 : vector<8x32xf32>
    %119 = vector.broadcast %96 : vector<1x32xf32> to vector<8x32xf32>
    %120 = arith.mulf %118, %119 : vector<8x32xf32>
    %121 = vector.broadcast %98 : vector<1x32xf32> to vector<8x32xf32>
    %122 = arith.addf %120, %121 : vector<8x32xf32>
    %123 = arith.truncf %122 : vector<8x32xf32> to vector<8x32xbf16>
    %c0_48 = arith.constant 0 : index
    %c0_49 = arith.constant 0 : index
    %c0_50 = arith.constant 0 : index
    %124 = vector.load %arg11[%c0_48, %c0_49, %c0_50] : memref<2x32x64xbf16, #tpu.memory_space<vmem>>, vector<1x32x64xbf16>
    %125 = vector.shape_cast %124 : vector<1x32x64xbf16> to vector<32x64xbf16>
    %cst_51 = arith.constant dense<0.000000e+00> : vector<8x64xf32>
    %126 = tpu.matmul %123, %125, %cst_51 {dimension_numbers = #tpu.dot_dimension_numbers<[1], [0], [0], [1], [0, 0, 1, 1], [], []>} : vector<8x32xbf16>, vector<32x64xbf16>, vector<8x64xf32> -> vector<8x64xf32>
    %c0_52 = arith.constant 0 : index
    %c0_53 = arith.constant 0 : index
    %c0_54 = arith.constant 0 : index
    %127 = vector.load %arg12[%c0_52, %c0_53, %c0_54] : memref<2x1x64xf32, #tpu.memory_space<vmem>>, vector<1x1x64xf32>
    %128 = vector.shape_cast %127 : vector<1x1x64xf32> to vector<1x64xf32>
    %129 = vector.broadcast %128 : vector<1x64xf32> to vector<8x64xf32>
    %130 = arith.addf %126, %129 : vector<8x64xf32>
    %cst_55 = arith.constant 5.000000e-01 : f32
    %131 = vector.broadcast %cst_55 : f32 to vector<8x64xf32>
    %132 = arith.mulf %131, %130 : vector<8x64xf32>
    %cst_56 = arith.constant 4.471500e-02 : f32
    %133 = vector.broadcast %cst_56 : f32 to vector<8x64xf32>
    %134 = arith.mulf %133, %130 : vector<8x64xf32>
    %135 = arith.mulf %134, %130 : vector<8x64xf32>
    %136 = arith.mulf %135, %130 : vector<8x64xf32>
    %137 = arith.addf %130, %136 : vector<8x64xf32>
    %cst_57 = arith.constant 0.797884583 : f32
    %138 = vector.broadcast %cst_57 : f32 to vector<8x64xf32>
    %139 = arith.mulf %138, %137 : vector<8x64xf32>
    %140 = math.tanh %139 : vector<8x64xf32>
    %cst_58 = arith.constant 1.000000e+00 : f32
    %141 = vector.broadcast %cst_58 : f32 to vector<8x64xf32>
    %142 = arith.addf %141, %140 : vector<8x64xf32>
    %143 = arith.mulf %132, %142 : vector<8x64xf32>
    %144 = arith.truncf %143 : vector<8x64xf32> to vector<8x64xbf16>
    %c0_59 = arith.constant 0 : index
    %c0_60 = arith.constant 0 : index
    %c0_61 = arith.constant 0 : index
    %145 = vector.load %arg13[%c0_59, %c0_60, %c0_61] : memref<2x64x32xbf16, #tpu.memory_space<vmem>>, vector<1x64x32xbf16>
    %146 = vector.shape_cast %145 : vector<1x64x32xbf16> to vector<64x32xbf16>
    %cst_62 = arith.constant dense<0.000000e+00> : vector<8x32xf32>
    %147 = tpu.matmul %144, %146, %cst_62 {dimension_numbers = #tpu.dot_dimension_numbers<[1], [0], [0], [1], [0, 0, 1, 1], [], []>} : vector<8x64xbf16>, vector<64x32xbf16>, vector<8x32xf32> -> vector<8x32xf32>
    %c0_63 = arith.constant 0 : index
    %c0_64 = arith.constant 0 : index
    %c0_65 = arith.constant 0 : index
    %148 = vector.load %arg14[%c0_63, %c0_64, %c0_65] : memref<2x1x32xf32, #tpu.memory_space<vmem>>, vector<1x1x32xf32>
    %149 = vector.shape_cast %148 : vector<1x1x32xf32> to vector<1x32xf32>
    %150 = vector.broadcast %149 : vector<1x32xf32> to vector<8x32xf32>
    %151 = arith.addf %147, %150 : vector<8x32xf32>
    %152 = arith.addf %151, %122 : vector<8x32xf32>
    %c0_66 = arith.constant 0 : index
    %c0_67 = arith.constant 0 : index
    %c0_68 = arith.constant 0 : index
    %153 = vector.load %arg15[%c0_66, %c0_67, %c0_68] : memref<2x1x32xf32, #tpu.memory_space<vmem>>, vector<1x1x32xf32>
    %154 = vector.shape_cast %153 : vector<1x1x32xf32> to vector<1x32xf32>
    %c0_69 = arith.constant 0 : index
    %c0_70 = arith.constant 0 : index
    %c0_71 = arith.constant 0 : index
    %155 = vector.load %arg16[%c0_69, %c0_70, %c0_71] : memref<2x1x32xf32, #tpu.memory_space<vmem>>, vector<1x1x32xf32>
    %156 = vector.shape_cast %155 : vector<1x1x32xf32> to vector<1x32xf32>
    %cst_72 = arith.constant dense<0.000000e+00> : vector<8xf32>
    %157 = vector.multi_reduction <add>, %152, %cst_72 [1] : vector<8x32xf32> to vector<8xf32>
    %158 = vector.shape_cast %157 : vector<8xf32> to vector<8x1xf32>
    %cst_73 = arith.constant 3.200000e+01 : f32
    %159 = vector.broadcast %cst_73 : f32 to vector<8x1xf32>
    %160 = arith.divf %158, %159 : vector<8x1xf32>
    %161 = vector.broadcast %160 : vector<8x1xf32> to vector<8x32xf32>
    %162 = arith.subf %152, %161 : vector<8x32xf32>
    %163 = vector.broadcast %160 : vector<8x1xf32> to vector<8x32xf32>
    %164 = arith.subf %152, %163 : vector<8x32xf32>
    %165 = arith.mulf %162, %164 : vector<8x32xf32>
    %cst_74 = arith.constant dense<0.000000e+00> : vector<8xf32>
    %166 = vector.multi_reduction <add>, %165, %cst_74 [1] : vector<8x32xf32> to vector<8xf32>
    %167 = vector.shape_cast %166 : vector<8xf32> to vector<8x1xf32>
    %cst_75 = arith.constant 3.200000e+01 : f32
    %168 = vector.broadcast %cst_75 : f32 to vector<8x1xf32>
    %169 = arith.divf %167, %168 : vector<8x1xf32>
    %170 = vector.broadcast %160 : vector<8x1xf32> to vector<8x32xf32>
    %171 = arith.subf %152, %170 : vector<8x32xf32>
    %cst_76 = arith.constant 9.99999996E-13 : f32
    %172 = vector.broadcast %cst_76 : f32 to vector<8x1xf32>
    %173 = arith.addf %169, %172 : vector<8x1xf32>
    %174 = math.rsqrt %173 : vector<8x1xf32>
    %175 = vector.broadcast %174 : vector<8x1xf32> to vector<8x32xf32>
    %176 = arith.mulf %171, %175 : vector<8x32xf32>
    %177 = vector.broadcast %154 : vector<1x32xf32> to vector<8x32xf32>
    %178 = arith.mulf %176, %177 : vector<8x32xf32>
    %179 = vector.broadcast %156 : vector<1x32xf32> to vector<8x32xf32>
    %180 = arith.addf %178, %179 : vector<8x32xf32>
    %181 = arith.truncf %180 : vector<8x32xf32> to vector<8x32xbf16>
    %c1 = arith.constant 1 : index
    %c0_77 = arith.constant 0 : index
    %c0_78 = arith.constant 0 : index
    %182 = vector.load %arg5[%c1, %c0_77, %c0_78] : memref<2x32x96xbf16, #tpu.memory_space<vmem>>, vector<1x32x96xbf16>
    %183 = vector.shape_cast %182 : vector<1x32x96xbf16> to vector<32x96xbf16>
    %cst_79 = arith.constant dense<0.000000e+00> : vector<8x96xf32>
    %184 = tpu.matmul %181, %183, %cst_79 {dimension_numbers = #tpu.dot_dimension_numbers<[1], [0], [0], [1], [0, 0, 1, 1], [], []>} : vector<8x32xbf16>, vector<32x96xbf16>, vector<8x96xf32> -> vector<8x96xf32>
    %c1_80 = arith.constant 1 : index
    %c0_81 = arith.constant 0 : index
    %c0_82 = arith.constant 0 : index
    %185 = vector.load %arg6[%c1_80, %c0_81, %c0_82] : memref<2x1x96xf32, #tpu.memory_space<vmem>>, vector<1x1x96xf32>
    %186 = vector.shape_cast %185 : vector<1x1x96xf32> to vector<1x96xf32>
    %187 = vector.broadcast %186 : vector<1x96xf32> to vector<8x96xf32>
    %188 = arith.addf %184, %187 : vector<8x96xf32>
    %189 = vector.extract_strided_slice %188 {offsets = [0, 0], sizes = [8, 16], strides = [1, 1]} : vector<8x96xf32> to vector<8x16xf32>
    %190 = vector.extract_strided_slice %188 {offsets = [0, 32], sizes = [8, 16], strides = [1, 1]} : vector<8x96xf32> to vector<8x16xf32>
    %191 = vector.extract_strided_slice %188 {offsets = [0, 64], sizes = [8, 16], strides = [1, 1]} : vector<8x96xf32> to vector<8x16xf32>
    %192 = arith.truncf %189 : vector<8x16xf32> to vector<8x16xbf16>
    %193 = arith.truncf %190 : vector<8x16xf32> to vector<8x16xbf16>
    %cst_83 = arith.constant dense<0.000000e+00> : vector<8x8xf32>
    %194 = tpu.matmul %192, %193, %cst_83 {dimension_numbers = #tpu.dot_dimension_numbers<[1], [1], [0], [0], [0, 0, 1, 0], [], []>} : vector<8x16xbf16>, vector<8x16xbf16>, vector<8x8xf32> -> vector<8x8xf32>
    %195 = arith.addf %194, %35 : vector<8x8xf32>
    %cst_84 = arith.constant dense<0xFF800000> : vector<8xf32>
    %196 = vector.multi_reduction <maximumf>, %195, %cst_84 [1] : vector<8x8xf32> to vector<8xf32>
    %197 = vector.shape_cast %196 : vector<8xf32> to vector<8x1xf32>
    %198 = vector.broadcast %197 : vector<8x1xf32> to vector<8x8xf32>
    %199 = arith.subf %195, %198 : vector<8x8xf32>
    %200 = math.exp %199 : vector<8x8xf32>
    %cst_85 = arith.constant dense<0.000000e+00> : vector<8xf32>
    %201 = vector.multi_reduction <add>, %200, %cst_85 [1] : vector<8x8xf32> to vector<8xf32>
    %202 = vector.shape_cast %201 : vector<8xf32> to vector<8x1xf32>
    %203 = arith.truncf %200 : vector<8x8xf32> to vector<8x8xbf16>
    %204 = arith.truncf %191 : vector<8x16xf32> to vector<8x16xbf16>
    %cst_86 = arith.constant dense<0.000000e+00> : vector<8x16xf32>
    %205 = tpu.matmul %203, %204, %cst_86 {dimension_numbers = #tpu.dot_dimension_numbers<[1], [0], [0], [1], [0, 0, 1, 1], [], []>} : vector<8x8xbf16>, vector<8x16xbf16>, vector<8x16xf32> -> vector<8x16xf32>
    %206 = tpu.reciprocal %202 {approx = true} : vector<8x1xf32> -> vector<8x1xf32>
    %207 = vector.broadcast %206 : vector<8x1xf32> to vector<8x16xf32>
    %208 = arith.mulf %205, %207 : vector<8x16xf32>
    %209 = arith.truncf %208 : vector<8x16xf32> to vector<8x16xbf16>
    %210 = vector.extract_strided_slice %188 {offsets = [0, 16], sizes = [8, 16], strides = [1, 1]} : vector<8x96xf32> to vector<8x16xf32>
    %211 = vector.extract_strided_slice %188 {offsets = [0, 48], sizes = [8, 16], strides = [1, 1]} : vector<8x96xf32> to vector<8x16xf32>
    %212 = vector.extract_strided_slice %188 {offsets = [0, 80], sizes = [8, 16], strides = [1, 1]} : vector<8x96xf32> to vector<8x16xf32>
    %213 = arith.truncf %210 : vector<8x16xf32> to vector<8x16xbf16>
    %214 = arith.truncf %211 : vector<8x16xf32> to vector<8x16xbf16>
    %cst_87 = arith.constant dense<0.000000e+00> : vector<8x8xf32>
    %215 = tpu.matmul %213, %214, %cst_87 {dimension_numbers = #tpu.dot_dimension_numbers<[1], [1], [0], [0], [0, 0, 1, 0], [], []>} : vector<8x16xbf16>, vector<8x16xbf16>, vector<8x8xf32> -> vector<8x8xf32>
    %216 = arith.addf %215, %35 : vector<8x8xf32>
    %cst_88 = arith.constant dense<0xFF800000> : vector<8xf32>
    %217 = vector.multi_reduction <maximumf>, %216, %cst_88 [1] : vector<8x8xf32> to vector<8xf32>
    %218 = vector.shape_cast %217 : vector<8xf32> to vector<8x1xf32>
    %219 = vector.broadcast %218 : vector<8x1xf32> to vector<8x8xf32>
    %220 = arith.subf %216, %219 : vector<8x8xf32>
    %221 = math.exp %220 : vector<8x8xf32>
    %cst_89 = arith.constant dense<0.000000e+00> : vector<8xf32>
    %222 = vector.multi_reduction <add>, %221, %cst_89 [1] : vector<8x8xf32> to vector<8xf32>
    %223 = vector.shape_cast %222 : vector<8xf32> to vector<8x1xf32>
    %224 = arith.truncf %221 : vector<8x8xf32> to vector<8x8xbf16>
    %225 = arith.truncf %212 : vector<8x16xf32> to vector<8x16xbf16>
    %cst_90 = arith.constant dense<0.000000e+00> : vector<8x16xf32>
    %226 = tpu.matmul %224, %225, %cst_90 {dimension_numbers = #tpu.dot_dimension_numbers<[1], [0], [0], [1], [0, 0, 1, 1], [], []>} : vector<8x8xbf16>, vector<8x16xbf16>, vector<8x16xf32> -> vector<8x16xf32>
    %227 = tpu.reciprocal %223 {approx = true} : vector<8x1xf32> -> vector<8x1xf32>
    %228 = vector.broadcast %227 : vector<8x1xf32> to vector<8x16xf32>
    %229 = arith.mulf %226, %228 : vector<8x16xf32>
    %230 = arith.truncf %229 : vector<8x16xf32> to vector<8x16xbf16>
    %231 = tpu.concatenate %209, %230 in 1 : vector<8x16xbf16>, vector<8x16xbf16> -> vector<8x32xbf16>
    %c1_91 = arith.constant 1 : index
    %c0_92 = arith.constant 0 : index
    %c0_93 = arith.constant 0 : index
    %232 = vector.load %arg7[%c1_91, %c0_92, %c0_93] : memref<2x32x32xbf16, #tpu.memory_space<vmem>>, vector<1x32x32xbf16>
    %233 = vector.shape_cast %232 : vector<1x32x32xbf16> to vector<32x32xbf16>
    %cst_94 = arith.constant dense<0.000000e+00> : vector<8x32xf32>
    %234 = tpu.matmul %231, %233, %cst_94 {dimension_numbers = #tpu.dot_dimension_numbers<[1], [0], [0], [1], [0, 0, 1, 1], [], []>} : vector<8x32xbf16>, vector<32x32xbf16>, vector<8x32xf32> -> vector<8x32xf32>
    %c1_95 = arith.constant 1 : index
    %c0_96 = arith.constant 0 : index
    %c0_97 = arith.constant 0 : index
    %235 = vector.load %arg8[%c1_95, %c0_96, %c0_97] : memref<2x1x32xf32, #tpu.memory_space<vmem>>, vector<1x1x32xf32>
    %236 = vector.shape_cast %235 : vector<1x1x32xf32> to vector<1x32xf32>
    %237 = vector.broadcast %236 : vector<1x32xf32> to vector<8x32xf32>
    %238 = arith.addf %234, %237 : vector<8x32xf32>
    %239 = arith.addf %238, %180 : vector<8x32xf32>
    %c1_98 = arith.constant 1 : index
    %c0_99 = arith.constant 0 : index
    %c0_100 = arith.constant 0 : index
    %240 = vector.load %arg9[%c1_98, %c0_99, %c0_100] : memref<2x1x32xf32, #tpu.memory_space<vmem>>, vector<1x1x32xf32>
    %241 = vector.shape_cast %240 : vector<1x1x32xf32> to vector<1x32xf32>
    %c1_101 = arith.constant 1 : index
    %c0_102 = arith.constant 0 : index
    %c0_103 = arith.constant 0 : index
    %242 = vector.load %arg10[%c1_101, %c0_102, %c0_103] : memref<2x1x32xf32, #tpu.memory_space<vmem>>, vector<1x1x32xf32>
    %243 = vector.shape_cast %242 : vector<1x1x32xf32> to vector<1x32xf32>
    %cst_104 = arith.constant dense<0.000000e+00> : vector<8xf32>
    %244 = vector.multi_reduction <add>, %239, %cst_104 [1] : vector<8x32xf32> to vector<8xf32>
    %245 = vector.shape_cast %244 : vector<8xf32> to vector<8x1xf32>
    %cst_105 = arith.constant 3.200000e+01 : f32
    %246 = vector.broadcast %cst_105 : f32 to vector<8x1xf32>
    %247 = arith.divf %245, %246 : vector<8x1xf32>
    %248 = vector.broadcast %247 : vector<8x1xf32> to vector<8x32xf32>
    %249 = arith.subf %239, %248 : vector<8x32xf32>
    %250 = vector.broadcast %247 : vector<8x1xf32> to vector<8x32xf32>
    %251 = arith.subf %239, %250 : vector<8x32xf32>
    %252 = arith.mulf %249, %251 : vector<8x32xf32>
    %cst_106 = arith.constant dense<0.000000e+00> : vector<8xf32>
    %253 = vector.multi_reduction <add>, %252, %cst_106 [1] : vector<8x32xf32> to vector<8xf32>
    %254 = vector.shape_cast %253 : vector<8xf32> to vector<8x1xf32>
    %cst_107 = arith.constant 3.200000e+01 : f32
    %255 = vector.broadcast %cst_107 : f32 to vector<8x1xf32>
    %256 = arith.divf %254, %255 : vector<8x1xf32>
    %257 = vector.broadcast %247 : vector<8x1xf32> to vector<8x32xf32>
    %258 = arith.subf %239, %257 : vector<8x32xf32>
    %cst_108 = arith.constant 9.99999996E-13 : f32
    %259 = vector.broadcast %cst_108 : f32 to vector<8x1xf32>
    %260 = arith.addf %256, %259 : vector<8x1xf32>
    %261 = math.rsqrt %260 : vector<8x1xf32>
    %262 = vector.broadcast %261 : vector<8x1xf32> to vector<8x32xf32>
    %263 = arith.mulf %258, %262 : vector<8x32xf32>
    %264 = vector.broadcast %241 : vector<1x32xf32> to vector<8x32xf32>
    %265 = arith.mulf %263, %264 : vector<8x32xf32>
    %266 = vector.broadcast %243 : vector<1x32xf32> to vector<8x32xf32>
    %267 = arith.addf %265, %266 : vector<8x32xf32>
    %268 = arith.truncf %267 : vector<8x32xf32> to vector<8x32xbf16>
    %c1_109 = arith.constant 1 : index
    %c0_110 = arith.constant 0 : index
    %c0_111 = arith.constant 0 : index
    %269 = vector.load %arg11[%c1_109, %c0_110, %c0_111] : memref<2x32x64xbf16, #tpu.memory_space<vmem>>, vector<1x32x64xbf16>
    %270 = vector.shape_cast %269 : vector<1x32x64xbf16> to vector<32x64xbf16>
    %cst_112 = arith.constant dense<0.000000e+00> : vector<8x64xf32>
    %271 = tpu.matmul %268, %270, %cst_112 {dimension_numbers = #tpu.dot_dimension_numbers<[1], [0], [0], [1], [0, 0, 1, 1], [], []>} : vector<8x32xbf16>, vector<32x64xbf16>, vector<8x64xf32> -> vector<8x64xf32>
    %c1_113 = arith.constant 1 : index
    %c0_114 = arith.constant 0 : index
    %c0_115 = arith.constant 0 : index
    %272 = vector.load %arg12[%c1_113, %c0_114, %c0_115] : memref<2x1x64xf32, #tpu.memory_space<vmem>>, vector<1x1x64xf32>
    %273 = vector.shape_cast %272 : vector<1x1x64xf32> to vector<1x64xf32>
    %274 = vector.broadcast %273 : vector<1x64xf32> to vector<8x64xf32>
    %275 = arith.addf %271, %274 : vector<8x64xf32>
    %cst_116 = arith.constant 5.000000e-01 : f32
    %276 = vector.broadcast %cst_116 : f32 to vector<8x64xf32>
    %277 = arith.mulf %276, %275 : vector<8x64xf32>
    %cst_117 = arith.constant 4.471500e-02 : f32
    %278 = vector.broadcast %cst_117 : f32 to vector<8x64xf32>
    %279 = arith.mulf %278, %275 : vector<8x64xf32>
    %280 = arith.mulf %279, %275 : vector<8x64xf32>
    %281 = arith.mulf %280, %275 : vector<8x64xf32>
    %282 = arith.addf %275, %281 : vector<8x64xf32>
    %cst_118 = arith.constant 0.797884583 : f32
    %283 = vector.broadcast %cst_118 : f32 to vector<8x64xf32>
    %284 = arith.mulf %283, %282 : vector<8x64xf32>
    %285 = math.tanh %284 : vector<8x64xf32>
    %cst_119 = arith.constant 1.000000e+00 : f32
    %286 = vector.broadcast %cst_119 : f32 to vector<8x64xf32>
    %287 = arith.addf %286, %285 : vector<8x64xf32>
    %288 = arith.mulf %277, %287 : vector<8x64xf32>
    %289 = arith.truncf %288 : vector<8x64xf32> to vector<8x64xbf16>
    %c1_120 = arith.constant 1 : index
    %c0_121 = arith.constant 0 : index
    %c0_122 = arith.constant 0 : index
    %290 = vector.load %arg13[%c1_120, %c0_121, %c0_122] : memref<2x64x32xbf16, #tpu.memory_space<vmem>>, vector<1x64x32xbf16>
    %291 = vector.shape_cast %290 : vector<1x64x32xbf16> to vector<64x32xbf16>
    %cst_123 = arith.constant dense<0.000000e+00> : vector<8x32xf32>
    %292 = tpu.matmul %289, %291, %cst_123 {dimension_numbers = #tpu.dot_dimension_numbers<[1], [0], [0], [1], [0, 0, 1, 1], [], []>} : vector<8x64xbf16>, vector<64x32xbf16>, vector<8x32xf32> -> vector<8x32xf32>
    %c1_124 = arith.constant 1 : index
    %c0_125 = arith.constant 0 : index
    %c0_126 = arith.constant 0 : index
    %293 = vector.load %arg14[%c1_124, %c0_125, %c0_126] : memref<2x1x32xf32, #tpu.memory_space<vmem>>, vector<1x1x32xf32>
    %294 = vector.shape_cast %293 : vector<1x1x32xf32> to vector<1x32xf32>
    %295 = vector.broadcast %294 : vector<1x32xf32> to vector<8x32xf32>
    %296 = arith.addf %292, %295 : vector<8x32xf32>
    %297 = arith.addf %296, %267 : vector<8x32xf32>
    %c1_127 = arith.constant 1 : index
    %c0_128 = arith.constant 0 : index
    %c0_129 = arith.constant 0 : index
    %298 = vector.load %arg15[%c1_127, %c0_128, %c0_129] : memref<2x1x32xf32, #tpu.memory_space<vmem>>, vector<1x1x32xf32>
    %299 = vector.shape_cast %298 : vector<1x1x32xf32> to vector<1x32xf32>
    %c1_130 = arith.constant 1 : index
    %c0_131 = arith.constant 0 : index
    %c0_132 = arith.constant 0 : index
    %300 = vector.load %arg16[%c1_130, %c0_131, %c0_132] : memref<2x1x32xf32, #tpu.memory_space<vmem>>, vector<1x1x32xf32>
    %301 = vector.shape_cast %300 : vector<1x1x32xf32> to vector<1x32xf32>
    %cst_133 = arith.constant dense<0.000000e+00> : vector<8xf32>
    %302 = vector.multi_reduction <add>, %297, %cst_133 [1] : vector<8x32xf32> to vector<8xf32>
    %303 = vector.shape_cast %302 : vector<8xf32> to vector<8x1xf32>
    %cst_134 = arith.constant 3.200000e+01 : f32
    %304 = vector.broadcast %cst_134 : f32 to vector<8x1xf32>
    %305 = arith.divf %303, %304 : vector<8x1xf32>
    %306 = vector.broadcast %305 : vector<8x1xf32> to vector<8x32xf32>
    %307 = arith.subf %297, %306 : vector<8x32xf32>
    %308 = vector.broadcast %305 : vector<8x1xf32> to vector<8x32xf32>
    %309 = arith.subf %297, %308 : vector<8x32xf32>
    %310 = arith.mulf %307, %309 : vector<8x32xf32>
    %cst_135 = arith.constant dense<0.000000e+00> : vector<8xf32>
    %311 = vector.multi_reduction <add>, %310, %cst_135 [1] : vector<8x32xf32> to vector<8xf32>
    %312 = vector.shape_cast %311 : vector<8xf32> to vector<8x1xf32>
    %cst_136 = arith.constant 3.200000e+01 : f32
    %313 = vector.broadcast %cst_136 : f32 to vector<8x1xf32>
    %314 = arith.divf %312, %313 : vector<8x1xf32>
    %315 = vector.broadcast %305 : vector<8x1xf32> to vector<8x32xf32>
    %316 = arith.subf %297, %315 : vector<8x32xf32>
    %cst_137 = arith.constant 9.99999996E-13 : f32
    %317 = vector.broadcast %cst_137 : f32 to vector<8x1xf32>
    %318 = arith.addf %314, %317 : vector<8x1xf32>
    %319 = math.rsqrt %318 : vector<8x1xf32>
    %320 = vector.broadcast %319 : vector<8x1xf32> to vector<8x32xf32>
    %321 = arith.mulf %316, %320 : vector<8x32xf32>
    %322 = vector.broadcast %299 : vector<1x32xf32> to vector<8x32xf32>
    %323 = arith.mulf %321, %322 : vector<8x32xf32>
    %324 = vector.broadcast %301 : vector<1x32xf32> to vector<8x32xf32>
    %325 = arith.addf %323, %324 : vector<8x32xf32>
    %326 = arith.truncf %325 : vector<8x32xf32> to vector<8x32xbf16>
    %c0_138 = arith.constant 0 : index
    %c0_139 = arith.constant 0 : index
    %327 = vector.load %arg17[%c0_138, %c0_139] : memref<32x128xbf16, #tpu.memory_space<vmem>>, vector<32x128xbf16>
    %cst_140 = arith.constant dense<0.000000e+00> : vector<8x128xf32>
    %328 = tpu.matmul %326, %327, %cst_140 {dimension_numbers = #tpu.dot_dimension_numbers<[1], [0], [0], [1], [0, 0, 1, 1], [], []>} : vector<8x32xbf16>, vector<32x128xbf16>, vector<8x128xf32> -> vector<8x128xf32>
    %c0_141 = arith.constant 0 : index
    %c0_142 = arith.constant 0 : index
    %329 = vector.load %arg18[%c0_141, %c0_142] : memref<1x128xf32, #tpu.memory_space<vmem>>, vector<1x128xf32>
    %330 = vector.broadcast %329 : vector<1x128xf32> to vector<8x128xf32>
    %331 = arith.addf %328, %330 : vector<8x128xf32>
    %c0_143 = arith.constant 0 : index
    %c0_144 = arith.constant 0 : index
    %c0_145 = arith.constant 0 : index
    %332 = vector.load %arg19[%c0_143, %c0_144, %c0_145] : memref<1x8x128xf32, #tpu.memory_space<vmem>>, vector<1x8x128xf32>
    %333 = vector.shape_cast %332 : vector<1x8x128xf32> to vector<8x128xf32>
    %334 = vector.shape_cast %331 : vector<8x128xf32> to vector<1x8x128xf32>
    tpu.vector_store %arg19[%c0_143, %c0_144, %c0_145], %334 {strides = array<i32>} : memref<1x8x128xf32, #tpu.memory_space<vmem>>, vector<1x8x128xf32>,
    return
  }
  func.func @transform_0(%arg0: i32) -> (i32, i32, i32) {
    %c0_i32 = arith.constant 0 : i32
    %c0_i32_0 = arith.constant 0 : i32
    %c0_i32_1 = arith.constant 0 : i32
    return %arg0, %c0_i32, %c0_i32_0 : i32, i32, i32
  }
  func.func @transform_1(%arg0: i32) -> (i32, i32, i32) {
    %c0_i32 = arith.constant 0 : i32
    %c0_i32_0 = arith.constant 0 : i32
    %c0_i32_1 = arith.constant 0 : i32
    return %arg0, %c0_i32, %c0_i32_0 : i32, i32, i32
  }
  func.func @transform_2(%arg0: i32) -> (i32, i32) {
    %c0_i32 = arith.constant 0 : i32
    %c0_i32_0 = arith.constant 0 : i32
    %c0_i32_1 = arith.constant 0 : i32
    return %c0_i32, %c0_i32_0 : i32, i32
  }
  func.func @transform_3(%arg0: i32) -> (i32, i32) {
    %c0_i32 = arith.constant 0 : i32
    %c0_i32_0 = arith.constant 0 : i32
    %c0_i32_1 = arith.constant 0 : i32
    return %c0_i32, %c0_i32_0 : i32, i32
  }
  func.func @transform_4(%arg0: i32) -> (i32, i32, i32) {
    %c0_i32 = arith.constant 0 : i32
    %c0_i32_0 = arith.constant 0 : i32
    %c0_i32_1 = arith.constant 0 : i32
    %c0_i32_2 = arith.constant 0 : i32
    return %c0_i32, %c0_i32_0, %c0_i32_1 : i32, i32, i32
  }
  func.func @transform_5(%arg0: i32) -> (i32, i32, i32) {
    %c0_i32 = arith.constant 0 : i32
    %c0_i32_0 = arith.constant 0 : i32
    %c0_i32_1 = arith.constant 0 : i32
    %c0_i32_2 = arith.constant 0 : i32
    return %c0_i32, %c0_i32_0, %c0_i32_1 : i32, i32, i32
  }
  func.func @transform_6(%arg0: i32) -> (i32, i32, i32) {
    %c0_i32 = arith.constant 0 : i32
    %c0_i32_0 = arith.constant 0 : i32
    %c0_i32_1 = arith.constant 0 : i32
    %c0_i32_2 = arith.constant 0 : i32
    return %c0_i32, %c0_i32_0, %c0_i32_1 : i32, i32, i32
  }
  func.func @transform_7(%arg0: i32) -> (i32, i32, i32) {
    %c0_i32 = arith.constant 0 : i32
    %c0_i32_0 = arith.constant 0 : i32
    %c0_i32_1 = arith.constant 0 : i32
    %c0_i32_2 = arith.constant 0 : i32
    return %c0_i32, %c0_i32_0, %c0_i32_1 : i32, i32, i32
  }
  func.func @transform_8(%arg0: i32) -> (i32, i32, i32) {
    %c0_i32 = arith.constant 0 : i32
    %c0_i32_0 = arith.constant 0 : i32
    %c0_i32_1 = arith.constant 0 : i32
    %c0_i32_2 = arith.constant 0 : i32
    return %c0_i32, %c0_i32_0, %c0_i32_1 : i32, i32, i32
  }
  func.func @transform_9(%arg0: i32) -> (i32, i32, i32) {
    %c0_i32 = arith.constant 0 : i32
    %c0_i32_0 = arith.constant 0 : i32
    %c0_i32_1 = arith.constant 0 : i32
    %c0_i32_2 = arith.constant 0 : i32
    return %c0_i32, %c0_i32_0, %c0_i32_1 : i32, i32, i32
  }
  func.func @transform_10(%arg0: i32) -> (i32, i32, i32) {
    %c0_i32 = arith.constant 0 : i32
    %c0_i32_0 = arith.constant 0 : i32
    %c0_i32_1 = arith.constant 0 : i32
    %c0_i32_2 = arith.constant 0 : i32
    return %c0_i32, %c0_i32_0, %c0_i32_1 : i32, i32, i32
  }
  func.func @transform_11(%arg0: i32) -> (i32, i32, i32) {
    %c0_i32 = arith.constant 0 : i32
    %c0_i32_0 = arith.constant 0 : i32
    %c0_i32_1 = arith.constant 0 : i32
    %c0_i32_2 = arith.constant 0 : i32
    return %c0_i32, %c0_i32_0, %c0_i32_1 : i32, i32, i32
  }
  func.func @transform_12(%arg0: i32) -> (i32, i32, i32) {
    %c0_i32 = arith.constant 0 : i32
    %c0_i32_0 = arith.constant 0 : i32
    %c0_i32_1 = arith.constant 0 : i32
    %c0_i32_2 = arith.constant 0 : i32
    return %c0_i32, %c0_i32_0, %c0_i32_1 : i32, i32, i32
  }
  func.func @transform_13(%arg0: i32) -> (i32, i32, i32) {
    %c0_i32 = arith.constant 0 : i32
    %c0_i32_0 = arith.constant 0 : i32
    %c0_i32_1 = arith.constant 0 : i32
    %c0_i32_2 = arith.constant 0 : i32
    return %c0_i32, %c0_i32_0, %c0_i32_1 : i32, i32, i32
  }
  func.func @transform_14(%arg0: i32) -> (i32, i32, i32) {
    %c0_i32 = arith.constant 0 : i32
    %c0_i32_0 = arith.constant 0 : i32
    %c0_i32_1 = arith.constant 0 : i32
    %c0_i32_2 = arith.constant 0 : i32
    return %c0_i32, %c0_i32_0, %c0_i32_1 : i32, i32, i32
  }
  func.func @transform_15(%arg0: i32) -> (i32, i32, i32) {
    %c0_i32 = arith.constant 0 : i32
    %c0_i32_0 = arith.constant 0 : i32
    %c0_i32_1 = arith.constant 0 : i32
    %c0_i32_2 = arith.constant 0 : i32
    return %c0_i32, %c0_i32_0, %c0_i32_1 : i32, i32, i32
  }
  func.func @transform_16(%arg0: i32) -> (i32, i32) {
    %c0_i32 = arith.constant 0 : i32
    %c0_i32_0 = arith.constant 0 : i32
    %c0_i32_1 = arith.constant 0 : i32
    return %c0_i32, %c0_i32_0 : i32, i32
  }
  func.func @transform_17(%arg0: i32) -> (i32, i32) {
    %c0_i32 = arith.constant 0 : i32
    %c0_i32_0 = arith.constant 0 : i32
    %c0_i32_1 = arith.constant 0 : i32
    return %c0_i32, %c0_i32_0 : i32, i32
  }
  func.func @transform_18(%arg0: i32) -> (i32, i32, i32) {
    %c0_i32 = arith.constant 0 : i32
    %c0_i32_0 = arith.constant 0 : i32
    %c0_i32_1 = arith.constant 0 : i32
    return %arg0, %c0_i32, %c0_i32_0 : i32, i32, i32
  }
}

</mosaic_0001>

<bundles_post_ra>
// kernel: forward.1
= control target key start
LH: loop header
LB: loop body
LE: loop exit
PB: predicated region body
PF: predicated region fallthrough
CT: control target
= control target key end

     0   :  { %s4434_s0 = inlined_call_operand.hbm [shape: f32[2,8,32], index: 0, kind: input, shape index: {}]   ;;  %s4435_s1 = inlined_call_operand.hbm [shape: f32[2,1,8], index: 1, kind: input, shape index: {}]   ;;  %s4436_s2 = inlined_call_operand.hbm [shape: f32[1,32], index: 2, kind: input, shape index: {}]   ;;  %s4437_s3 = inlined_call_operand.hbm [shape: f32[1,32], index: 3, kind: input, shape index: {}]   ;;  %s4438_s4 = inlined_call_operand.hbm [shape: bf16[2,32,96], index: 4, kind: input, shape index: {}]   ;;  %s4439_s5 = inlined_call_operand.hbm [shape: f32[2,1,96], index: 5, kind: input, shape index: {}]   ;;  %s4440_s6 = inlined_call_operand.hbm [shape: bf16[2,32,32], index: 6, kind: input, shape index: {}]   ;;  %s4441_s7 = inlined_call_operand.hbm [shape: f32[2,1,32], index: 7, kind: input, shape index: {}]   ;;  %s4442_s8 = inlined_call_operand.hbm [shape: f32[2,1,32], index: 8, kind: input, shape index: {}]   ;;  %s4443_s9 = inlined_call_operand.hbm [shape: f32[2,1,32], index: 9, kind: input, shape index: {}]   ;;  %s4444_s10 = inlined_call_operand.hbm [shape: bf16[2,32,64], index: 10, kind: input, shape index: {}]   ;;  %s4445_s11 = inlined_call_operand.hbm [shape: f32[2,1,64], index: 11, kind: input, shape index: {}]   ;;  %s4446_s12 = inlined_call_operand.hbm [shape: bf16[2,64,32], index: 12, kind: input, shape index: {}]   ;;  %s4447_s13 = inlined_call_operand.hbm [shape: f32[2,1,32], index: 13, kind: input, shape index: {}]   ;;  %s4448_s14 = inlined_call_operand.hbm [shape: f32[2,1,32], index: 14, kind: input, shape index: {}]   ;;  %s4449_s15 = inlined_call_operand.hbm [shape: f32[2,1,32], index: 15, kind: input, shape index: {}]   ;;  %s4450_s16 = inlined_call_operand.hbm [shape: bf16[32,128], index: 16, kind: input, shape index: {}]   ;;  %s4451_s17 = inlined_call_operand.hbm [shape: f32[1,128], index: 17, kind: input, shape index: {}]   ;;  %s4452_s18 = inlined_call_operand.hbm [shape: f32[2,8,128], index: 18, kind: output, shape index: {}]  }
   0x1   :  { %4477 = sst [smem:[#allocation50_spill]] %s4434_s0 }
   0x2   :  { %4478 = sst [smem:[#allocation51_spill]] %s4435_s1 }
   0x3   :  { %4479 = sst [smem:[#allocation52_spill]] %s4436_s2 }
   0x4   :  { %4480 = sst [smem:[#allocation53_spill]] %s4437_s3 }
   0x5   :  { %4481 = sst [smem:[#allocation54_spill]] %s4438_s4 }
   0x6   :  { %4482 = sst [smem:[#allocation55_spill]] %s4439_s5 }
   0x7   :  { %4483 = sst [smem:[#allocation56_spill]] %s4440_s6 }
   0x8   :  { %4484 = sst [smem:[#allocation57_spill]] %s4441_s7 }
   0x9   :  { %4485 = sst [smem:[#allocation58_spill]] %s4442_s8 }
   0xa   :  { %4486 = sst [smem:[#allocation59_spill]] %s4451_s17 }
   0xb   :  { %4487 = sst [smem:[#allocation60_spill]] %s4452_s18 }
   0xc   :  { %23 = vsyncpa [#allocation3], 0 }
   0xd   :  { %25 = vsyncpa [#allocation3 + $0x1], 0 }
   0xe   :  { %26 = vsyncpa [#allocation6], 0 }
   0xf   :  { %28 = vsyncpa [#allocation6 + $0x1], 0 }
  0x10   :  { %29 = vsyncpa [#allocation9], 0 }
  0x11   :  { %30 = vsyncpa [#allocation12], 0 }
  0x12   :  { %31 = vsyncpa [#allocation15], 0 }
  0x13   :  { %32 = vsyncpa [#allocation18], 0 }
  0x14   :  { %33 = vsyncpa [#allocation21], 0 }
  0x15   :  { %34 = vsyncpa [#allocation24], 0 }
  0x16   :  { %35 = vsyncpa [#allocation27], 0 }
  0x17   :  { %36 = vsyncpa [#allocation30], 0 }
  0x18   :  { %37 = vsyncpa [#allocation4], 0 }
  0x19   :  { %39 = vsyncpa [#allocation4 + $0x1], 0  ;;  %s3687_s27 = smov 0   ;;  %s3689_s28 = smov 0  }
  0x1a   :  { %s3691_s29 = smov 0   ;;  %s3693_s30 = smov 0  }
  0x1b LB: > { %4488 = sst [smem:[#allocation44_spill]] %s3547_s27  ;;  %s3561_s0 = smov [#allocation7]   ;;  %s3559_s30 = sphi %s3693_s30, %s4084_s30   ;;  %s3555_s29 = sphi %s3691_s29, %s4555_s29   ;;  %s3551_s28 = sphi %s3689_s28, %s4554_s28   ;;  %s3547_s27 = sphi %s3687_s27, %s4553_s27  }
  0x1c   : > { %4489 = sst [smem:[#allocation45_spill]] %s3551_s28  ;;  %s477_s19 = sshll.u32 %s3561_s0, 4  ;;  %s3713_s19 = int_to_ptr.vmem [resolvable:$true] %s477_s19 }
  0x1d   : > { %4490 = sst [smem:[#allocation46_spill]] %s3555_s29  ;;  %s3708_s1 = sadd.s32 4294967295, %s3559_s30  }
  0x1e   : > { %4491 = sst [smem:[#allocation47_spill]] %s3559_s30  ;;  %p2392_p0 = scmp.ge.s32.totalorder %s3559_s30, 1 }
  0x1f   : > { %4492 = sst [smem:[#allocation48_spill]] %s3708_s1  ;;  %p4467_p1 = scmp.eq.s32.totalorder %s3708_s1, 0 }
  0x20   : > { %p464_p2 = scmp.lt.s32.totalorder %s3559_s30, 3  ;;  %s3562_s21 = smov [#allocation8]  }
  0x21   : > { %s488_s22 = sshll.u32 %s3562_s21, 4  ;;  %s3563_s2 = smov [#allocation11]   ;;  %s3722_s22 = int_to_ptr.vmem [resolvable:$true] %s488_s22 }
  0x22   : > { %p3715_p3 = pnand %p2392_p0, %p464_p2  ;;  %s511_s23 = sshll.u32 %s3563_s2, 4  ;;  %s3730_s23 = int_to_ptr.vmem [resolvable:$true] %s511_s23 }
  0x23   : > { %s4496_s0 = sld [smem:[#allocation52_spill]] }
  0x24   : > { %s4493_s20 = scalar_select %p3715_p3, 1, 0 }
  0x25   : > { %p2739_p5 = pneg %p3715_p3 }
  0x26   : > { %4494 = sst [smem:[#allocation49_spill]] %s4493_s20 }
  0x27   : > { %p3726_p6 = pnand %p2739_p5, %p4467_p1 }
  0x29   : > { %s2945_s18 = scalar_lea.hbm %s4496_s0, 16  ;;  %p3740_p8 = pneg %p3726_p6 }
  0x2a   : > { %p2946_p7 = scmp.ne.s32.totalorder %s4496_s0, %s2945_s18  ;;  %p2952_p11 = scmp.lt.u32.totalorder %s2945_s18, %s4496_s0 }
  0x2c   : > { %p2948_p9 = pnand %p3740_p8, %p2946_p7 }
  0x2e   : > { %p2949_p10 = pneg %p2948_p9 }
  0x30   : > { %p2954_p12 = pnand %p2952_p11, %p2949_p10 }
  0x32   : > { %2957 = shalt.err (!%p2954_p12)
}
  0x33   : > { %s2958_s27 = scalar_lea.vmem %s3713_s19, 16  ;;  %s2965_s20 = scalar_lea.vmem %s3713_s19, 32 }
  0x34   : > { %p2959_p13 = scmp.ne.s32.totalorder %s3713_s19, %s2958_s27  ;;  %p2966_p5 = scmp.lt.s32.totalorder %s3713_s19, %s3713_s19 }
  0x35   : > { %p2967_p7 = scmp.lt.s32.totalorder %s2965_s20, %s2958_s27 }
  0x36   : > { %p2961_p0 = pnand %p2959_p13, %p3740_p8 }
  0x37   : > { %p2968_p9 = por %p2967_p7, %p2966_p5 }
  0x38   : > { %p2962_p2 = pneg %p2961_p0 }
  0x3a   : > { %p2969_p4 = pnand %p2968_p9, %p2962_p2 }
  0x3c   : > { %2972 = shalt.err (!%p2969_p4)
}
  0x3d   : > { %2742 = dma.hbm_to_vmem [thread:$0]  (!%p3726_p6), %s4496_s0, 16, %s3713_s19, [#allocation6]  }
  0x3e   : > { %s4498_s3 = sld [smem:[#allocation53_spill]] }
  0x44   : > { %s2973_s2 = scalar_lea.hbm %s4498_s3, 16 }
  0x45   : > { %p2974_p10 = scmp.ne.s32.totalorder %s4498_s3, %s2973_s2  ;;  %p2980_p4 = scmp.lt.u32.totalorder %s2973_s2, %s4498_s3 }
  0x47   : > { %p2976_p11 = pnand %p2974_p10, %p3740_p8 }
  0x49   : > { %p2977_p12 = pneg %p2976_p11 }
  0x4b   : > { %p2982_p13 = pnand %p2980_p4, %p2977_p12 }
  0x4d   : > { %2985 = shalt.err (!%p2982_p13)
}
  0x4e   : > { %s2986_s19 = scalar_lea.vmem %s3722_s22, 16  ;;  %s2993_s28 = scalar_lea.vmem %s3722_s22, 32 }
  0x4f   : > { %p2987_p0 = scmp.ne.s32.totalorder %s3722_s22, %s2986_s19  ;;  %p2994_p7 = scmp.lt.s32.totalorder %s3722_s22, %s3722_s22 }
  0x50   : > { %p2995_p9 = scmp.lt.s32.totalorder %s2993_s28, %s2986_s19 }
  0x51   : > { %p2989_p2 = pnand %p2987_p0, %p3740_p8 }
  0x52   : > { %p2996_p10 = por %p2995_p9, %p2994_p7 }
  0x53   : > { %p2990_p5 = pneg %p2989_p2 }
  0x55   : > { %p2997_p11 = pnand %p2996_p10, %p2990_p5 }
  0x57   : > { %3000 = shalt.err (!%p2997_p11)
}
  0x58   : > { %2745 = dma.hbm_to_vmem [thread:$0]  (!%p3726_p6), %s4498_s3, 16, %s3722_s22, [#allocation9]  }
  0x59   : > { %s4499_s5 = sld [smem:[#allocation55_spill]] }
  0x5f   : > { %s3001_s26 = scalar_lea.hbm %s4499_s5, 32 }
  0x60   : > { %p3002_p12 = scmp.ne.s32.totalorder %s4499_s5, %s3001_s26  ;;  %p3008_p0 = scmp.lt.u32.totalorder %s3001_s26, %s4499_s5 }
  0x62   : > { %p3004_p4 = pnand %p3002_p12, %p3740_p8 }
  0x64   : > { %p3005_p13 = pneg %p3004_p4 }
  0x66   : > { %p3010_p2 = pnand %p3008_p0, %p3005_p13 }
  0x68   : > { %3013 = shalt.err (!%p3010_p2)
}
  0x69   : > { %s3014_s22 = scalar_lea.vmem %s3730_s23, 32  ;;  %p3022_p10 = scmp.lt.s32.totalorder %s3730_s23, %s3730_s23 }
  0x6a   : > { %p3015_p5 = scmp.ne.s32.totalorder %s3730_s23, %s3014_s22  ;;  %p3023_p11 = scmp.lt.s32.totalorder %s3014_s22, %s3014_s22 }
  0x6c   : > { %p3017_p7 = pnand %p3015_p5, %p3740_p8  ;;  %p3024_p12 = por %p3023_p11, %p3022_p10 }
  0x6e   : > { %p3018_p9 = pneg %p3017_p7 }
  0x70   : > { %p3025_p4 = pnand %p3024_p12, %p3018_p9 }
  0x72   : > { %3028 = shalt.err (!%p3025_p4)
}
  0x73   : > { %s4469_s28 = smov 16   ;;  %s4471_s29 = smov 1  }
  0x74   : > { %2751 = dma.hbm_to_vmem [thread:$0]  (!%p3726_p6), %s4499_s5, 32, %s3730_s23, [#allocation12], %s4469_s28, %s4469_s28, %s4471_s29  }
  0x75   : > { %s3566_s25 = smov [#allocation14]   ;;  %s3567_s2 = smov [#allocation17]  }
  0x76   : > { %s537_s26 = sshll.u32 %s3566_s25, 4  ;;  %s563_s27 = sshll.u32 %s3567_s2, 4  ;;  %s538_s26 = int_to_ptr.vmem [resolvable:$true] %s537_s26  ;;  %s564_s27 = int_to_ptr.vmem [resolvable:$true] %s563_s27 }
  0x77   : > { %s4500_s7 = sld [smem:[#allocation57_spill]] }
  0x7d   : > { %s3029_s22 = scalar_lea.hbm %s4500_s7, 32 }
  0x7e   : > { %p3030_p13 = scmp.ne.s32.totalorder %s4500_s7, %s3029_s22  ;;  %p3036_p5 = scmp.lt.u32.totalorder %s3029_s22, %s4500_s7 }
  0x80   : > { %p3032_p0 = pnand %p3030_p13, %p3740_p8 }
  0x82   : > { %p3033_p2 = pneg %p3032_p0 }
  0x84   : > { %p3038_p7 = pnand %p3036_p5, %p3033_p2 }
  0x86   : > { %3041 = shalt.err (!%p3038_p7)
}
  0x87   : > { %s3042_s23 = scalar_lea.vmem %s538_s26, 32  ;;  %p3050_p12 = scmp.lt.s32.totalorder %s538_s26, %s538_s26 }
  0x88   : > { %p3043_p9 = scmp.ne.s32.totalorder %s538_s26, %s3042_s23  ;;  %p3051_p4 = scmp.lt.s32.totalorder %s3042_s23, %s3042_s23 }
  0x8a   : > { %p3045_p10 = pnand %p3043_p9, %p3740_p8  ;;  %p3052_p1 = por %p3051_p4, %p3050_p12 }
  0x8c   : > { %p3046_p11 = pneg %p3045_p10 }
  0x8e   : > { %p3053_p3 = pnand %p3052_p1, %p3046_p11 }
  0x90   : > { %3056 = shalt.err (!%p3053_p3)
}
  0x91   : > { %2757 = dma.hbm_to_vmem [thread:$0]  (!%p3726_p6), %s4500_s7, 32, %s538_s26, [#allocation15], %s4469_s28, %s4469_s28, %s4471_s29  }
  0x92   : > { %s3057_s18 = scalar_lea.hbm %s4443_s9, 32 }
  0x93   : > { %p3058_p1 = scmp.ne.s32.totalorder %s4443_s9, %s3057_s18  ;;  %p3064_p0 = scmp.lt.u32.totalorder %s3057_s18, %s4443_s9 }
  0x95   : > { %p3060_p3 = pnand %p3058_p1, %p3740_p8 }
  0x97   : > { %p3061_p13 = pneg %p3060_p3 }
  0x99   : > { %p3066_p2 = pnand %p3064_p0, %p3061_p13 }
  0x9b   : > { %3069 = shalt.err (!%p3066_p2)
}
  0x9c   : > { %s3070_s19 = scalar_lea.vmem %s564_s27, 32  ;;  %p3078_p10 = scmp.lt.s32.totalorder %s564_s27, %s564_s27 }
  0x9d   : > { %p3071_p5 = scmp.ne.s32.totalorder %s564_s27, %s3070_s19  ;;  %p3079_p11 = scmp.lt.s32.totalorder %s3070_s19, %s3070_s19 }
  0x9f   : > { %p3073_p7 = pnand %p3071_p5, %p3740_p8  ;;  %p3080_p12 = por %p3079_p11, %p3078_p10 }
  0xa1   : > { %p3074_p9 = pneg %p3073_p7 }
  0xa3   : > { %p3081_p4 = pnand %p3080_p12, %p3074_p9 }
  0xa5   : > { %3084 = shalt.err (!%p3081_p4)
}
  0xa6   : > { %2763 = dma.hbm_to_vmem [thread:$0]  (!%p3726_p6), %s4443_s9, 32, %s564_s27, [#allocation18], %s4469_s28, %s4469_s28, %s4471_s29  }
  0xa7   : > { %s3568_s23 = smov [#allocation20]   ;;  %s3569_s17 = smov [#allocation23]  }
  0xa8   : > { %s589_s3 = sshll.u32 %s3568_s23, 4  ;;  %s615_s30 = sshll.u32 %s3569_s17, 4  ;;  %s590_s3 = int_to_ptr.vmem [resolvable:$true] %s589_s3  ;;  %s616_s30 = int_to_ptr.vmem [resolvable:$true] %s615_s30 }
  0xa9   : > { %s3085_s1 = scalar_lea.hbm %s4445_s11, 32 }
  0xaa   : > { %p3086_p1 = scmp.ne.s32.totalorder %s4445_s11, %s3085_s1  ;;  %p3092_p0 = scmp.lt.u32.totalorder %s3085_s1, %s4445_s11 }
  0xac   : > { %p3088_p3 = pnand %p3086_p1, %p3740_p8 }
  0xae   : > { %p3089_p13 = pneg %p3088_p3 }
  0xb0   : > { %p3094_p2 = pnand %p3092_p0, %p3089_p13 }
  0xb2   : > { %3097 = shalt.err (!%p3094_p2)
}
  0xb3   : > { %s3098_s27 = scalar_lea.vmem %s590_s3, 32  ;;  %p3106_p10 = scmp.lt.s32.totalorder %s590_s3, %s590_s3 }
  0xb4   : > { %p3099_p5 = scmp.ne.s32.totalorder %s590_s3, %s3098_s27  ;;  %p3107_p11 = scmp.lt.s32.totalorder %s3098_s27, %s3098_s27 }
  0xb6   : > { %p3101_p7 = pnand %p3099_p5, %p3740_p8  ;;  %p3108_p12 = por %p3107_p11, %p3106_p10 }
  0xb8   : > { %p3102_p9 = pneg %p3101_p7 }
  0xba   : > { %p3109_p4 = pnand %p3108_p12, %p3102_p9 }
  0xbc   : > { %3112 = shalt.err (!%p3109_p4)
}
  0xbd   : > { %2769 = dma.hbm_to_vmem [thread:$0]  (!%p3726_p6), %s4445_s11, 32, %s590_s3, [#allocation21], %s4469_s28, %s4469_s28, %s4471_s29  }
  0xbe   : > { %s3113_s0 = scalar_lea.hbm %s4447_s13, 32 }
  0xbf   : > { %p3114_p1 = scmp.ne.s32.totalorder %s4447_s13, %s3113_s0  ;;  %p3120_p0 = scmp.lt.u32.totalorder %s3113_s0, %s4447_s13 }
  0xc1   : > { %p3116_p3 = pnand %p3114_p1, %p3740_p8 }
  0xc3   : > { %p3117_p13 = pneg %p3116_p3 }
  0xc5   : > { %p3122_p2 = pnand %p3120_p0, %p3117_p13 }
  0xc7   : > { %3125 = shalt.err (!%p3122_p2)
}
  0xc8   : > { %s3126_s20 = scalar_lea.vmem %s616_s30, 32  ;;  %p3134_p10 = scmp.lt.s32.totalorder %s616_s30, %s616_s30 }
  0xc9   : > { %p3127_p5 = scmp.ne.s32.totalorder %s616_s30, %s3126_s20  ;;  %p3135_p11 = scmp.lt.s32.totalorder %s3126_s20, %s3126_s20 }
  0xcb   : > { %p3129_p7 = pnand %p3127_p5, %p3740_p8  ;;  %p3136_p12 = por %p3135_p11, %p3134_p10 }
  0xcd   : > { %p3130_p9 = pneg %p3129_p7 }
  0xcf   : > { %p3137_p4 = pnand %p3136_p12, %p3130_p9 }
  0xd1   : > { %3140 = shalt.err (!%p3137_p4)
}
  0xd2   : > { %2775 = dma.hbm_to_vmem [thread:$0]  (!%p3726_p6), %s4447_s13, 32, %s616_s30, [#allocation24], %s4469_s28, %s4469_s28, %s4471_s29  }
  0xd3   : > { %s3570_s27 = smov [#allocation26]   ;;  %s3571_s22 = smov [#allocation10]  }
  0xd4   : > { %s641_s26 = sshll.u32 %s3570_s27, 4  ;;  %s498_s23 = sshll.u32 %s3571_s22, 4  ;;  %s642_s26 = int_to_ptr.vmem [resolvable:$true] %s641_s26  ;;  %s499_s23 = int_to_ptr.vmem [resolvable:$true] %s498_s23 }
  0xd5   : > { %s3141_s18 = scalar_lea.hbm %s4449_s15, 32 }
  0xd6   : > { %p3142_p1 = scmp.ne.s32.totalorder %s4449_s15, %s3141_s18  ;;  %p3148_p0 = scmp.lt.u32.totalorder %s3141_s18, %s4449_s15 }
  0xd8   : > { %p3144_p3 = pnand %p3142_p1, %p3740_p8 }
  0xda   : > { %p3145_p13 = pneg %p3144_p3 }
  0xdc   : > { %p3150_p2 = pnand %p3148_p0, %p3145_p13 }
  0xde   : > { %3153 = shalt.err (!%p3150_p2)
}
  0xdf   : > { %s3154_s30 = scalar_lea.vmem %s642_s26, 32  ;;  %p3162_p10 = scmp.lt.s32.totalorder %s642_s26, %s642_s26 }
  0xe0   : > { %p3155_p5 = scmp.ne.s32.totalorder %s642_s26, %s3154_s30  ;;  %p3163_p11 = scmp.lt.s32.totalorder %s3154_s30, %s3154_s30 }
  0xe2   : > { %p3157_p7 = pnand %p3155_p5, %p3740_p8  ;;  %p3164_p12 = por %p3163_p11, %p3162_p10 }
  0xe4   : > { %p3158_p9 = pneg %p3157_p7 }
  0xe6   : > { %p3165_p4 = pnand %p3164_p12, %p3158_p9 }
  0xe8   : > { %3168 = shalt.err (!%p3165_p4)
}
  0xe9   : > { %2781 = dma.hbm_to_vmem [thread:$0]  (!%p3726_p6), %s4449_s15, 32, %s642_s26, [#allocation27], %s4469_s28, %s4469_s28, %s4471_s29  }
  0xea   : > { %s4501_s4 = sld [smem:[#allocation54_spill]] }
  0xf0   : > { %s3169_s17 = scalar_lea.hbm %s4501_s4, 512 }
  0xf1   : > { %p3170_p1 = scmp.ne.s32.totalorder %s4501_s4, %s3169_s17  ;;  %p3176_p0 = scmp.lt.u32.totalorder %s3169_s17, %s4501_s4 }
  0xf3   : > { %p3172_p3 = pnand %p3170_p1, %p3740_p8 }
  0xf5   : > { %p3173_p13 = pneg %p3172_p3 }
  0xf7   : > { %p3178_p2 = pnand %p3176_p0, %p3173_p13 }
  0xf9   : > { %3181 = shalt.err (!%p3178_p2)
}
  0xfa   : > { %s3182_s2 = scalar_lea.vmem %s499_s23, 512  ;;  %p3190_p10 = scmp.lt.s32.totalorder %s499_s23, %s499_s23 }
  0xfb   : > { %p3183_p5 = scmp.ne.s32.totalorder %s499_s23, %s3182_s2  ;;  %p3191_p11 = scmp.lt.s32.totalorder %s3182_s2, %s3182_s2 }
  0xfd   : > { %p3185_p7 = pnand %p3183_p5, %p3740_p8  ;;  %p3192_p12 = por %p3191_p11, %p3190_p10 }
  0xff   : > { %p3186_p9 = pneg %p3185_p7 }
 0x101   : > { %p3193_p4 = pnand %p3192_p12, %p3186_p9 }
 0x103   : > { %3196 = shalt.err (!%p3193_p4)
}
 0x104   : > { %s4473_s26 = smov 64   ;;  %s3573_s20 = smov 4  }
 0x105   : > { %2748 = dma.hbm_to_vmem [thread:$0]  (!%p3726_p6), %s4501_s4, 512, %s499_s23, [#allocation9], %s4473_s26, %s4473_s26, %s3573_s20  }
 0x106   : > { %s3574_s19 = smov [#allocation13]   ;;  %s3575_s22 = smov [#allocation16]  }
 0x107   : > { %s524_s27 = sshll.u32 %s3574_s19, 4  ;;  %s550_s17 = sshll.u32 %s3575_s22, 4  ;;  %s525_s27 = int_to_ptr.vmem [resolvable:$true] %s524_s27  ;;  %s551_s17 = int_to_ptr.vmem [resolvable:$true] %s550_s17 }
 0x108   : > { %s4502_s6 = sld [smem:[#allocation56_spill]] }
 0x10e   : > { %s3197_s1 = scalar_lea.hbm %s4502_s6, 512 }
 0x10f   : > { %p3198_p1 = scmp.ne.s32.totalorder %s4502_s6, %s3197_s1  ;;  %p3204_p0 = scmp.lt.u32.totalorder %s3197_s1, %s4502_s6 }
 0x111   : > { %p3200_p3 = pnand %p3198_p1, %p3740_p8 }
 0x113   : > { %p3201_p13 = pneg %p3200_p3 }
 0x115   : > { %p3206_p2 = pnand %p3204_p0, %p3201_p13 }
 0x117   : > { %3209 = shalt.err (!%p3206_p2)
}
 0x118   : > { %s3210_s23 = scalar_lea.vmem %s525_s27, 512  ;;  %p3218_p10 = scmp.lt.s32.totalorder %s525_s27, %s525_s27 }
 0x119   : > { %p3211_p5 = scmp.ne.s32.totalorder %s525_s27, %s3210_s23  ;;  %p3219_p11 = scmp.lt.s32.totalorder %s3210_s23, %s3210_s23 }
 0x11b   : > { %p3213_p7 = pnand %p3211_p5, %p3740_p8  ;;  %p3220_p12 = por %p3219_p11, %p3218_p10 }
 0x11d   : > { %p3214_p9 = pneg %p3213_p7 }
 0x11f   : > { %p3221_p4 = pnand %p3220_p12, %p3214_p9 }
 0x121   : > { %3224 = shalt.err (!%p3221_p4)
}
 0x122   : > { %2754 = dma.hbm_to_vmem [thread:$0]  (!%p3726_p6), %s4502_s6, 512, %s525_s27, [#allocation12], %s4473_s26, %s4473_s26, %s3573_s20  }
 0x123   : > { %s4503_s8 = sld [smem:[#allocation58_spill]] }
 0x129   : > { %s3225_s19 = scalar_lea.hbm %s4503_s8, 32 }
 0x12a   : > { %p3226_p1 = scmp.ne.s32.totalorder %s4503_s8, %s3225_s19  ;;  %p3232_p0 = scmp.lt.u32.totalorder %s3225_s19, %s4503_s8 }
 0x12c   : > { %p3228_p3 = pnand %p3226_p1, %p3740_p8 }
 0x12e   : > { %p3229_p13 = pneg %p3228_p3 }
 0x130   : > { %p3234_p2 = pnand %p3232_p0, %p3229_p13 }
 0x132   : > { %3237 = shalt.err (!%p3234_p2)
}
 0x133   : > { %s3238_s25 = scalar_lea.vmem %s551_s17, 32  ;;  %p3246_p10 = scmp.lt.s32.totalorder %s551_s17, %s551_s17 }
 0x134   : > { %p3239_p5 = scmp.ne.s32.totalorder %s551_s17, %s3238_s25  ;;  %p3247_p11 = scmp.lt.s32.totalorder %s3238_s25, %s3238_s25 }
 0x136   : > { %p3241_p7 = pnand %p3239_p5, %p3740_p8  ;;  %p3248_p12 = por %p3247_p11, %p3246_p10 }
 0x138   : > { %p3242_p9 = pneg %p3241_p7 }
 0x13a   : > { %p3249_p4 = pnand %p3248_p12, %p3242_p9 }
 0x13c   : > { %3252 = shalt.err (!%p3249_p4)
}
 0x13d   : > { %s4504_s27 = smov 1   ;;  %s4505_s2 = smov 16  }
 0x13e   : > { %2760 = dma.hbm_to_vmem [thread:$0]  (!%p3726_p6), %s4503_s8, 32, %s551_s17, [#allocation15], %s4505_s2, %s4505_s2, %s4504_s27  }
 0x13f   : > { %s3576_s29 = smov [#allocation19]   ;;  %s3577_s3 = smov [#allocation22]  }
 0x140   : > { %s576_s30 = sshll.u32 %s3576_s29, 4  ;;  %s602_s19 = sshll.u32 %s3577_s3, 4  ;;  %s577_s30 = int_to_ptr.vmem [resolvable:$true] %s576_s30  ;;  %s603_s19 = int_to_ptr.vmem [resolvable:$true] %s602_s19 }
 0x141   : > { %s3253_s18 = scalar_lea.hbm %s4444_s10, 512 }
 0x142   : > { %p3254_p1 = scmp.ne.s32.totalorder %s4444_s10, %s3253_s18  ;;  %p3260_p0 = scmp.lt.u32.totalorder %s3253_s18, %s4444_s10 }
 0x144   : > { %p3256_p3 = pnand %p3254_p1, %p3740_p8 }
 0x146   : > { %p3257_p13 = pneg %p3256_p3 }
 0x148   : > { %p3262_p2 = pnand %p3260_p0, %p3257_p13 }
 0x14a   : > { %3265 = shalt.err (!%p3262_p2)
}
 0x14b   : > { %s3266_s17 = scalar_lea.vmem %s577_s30, 512  ;;  %p3274_p10 = scmp.lt.s32.totalorder %s577_s30, %s577_s30 }
 0x14c   : > { %p3267_p5 = scmp.ne.s32.totalorder %s577_s30, %s3266_s17  ;;  %p3275_p11 = scmp.lt.s32.totalorder %s3266_s17, %s3266_s17 }
 0x14e   : > { %p3269_p7 = pnand %p3267_p5, %p3740_p8  ;;  %p3276_p12 = por %p3275_p11, %p3274_p10 }
 0x150   : > { %p3270_p9 = pneg %p3269_p7 }
 0x152   : > { %p3277_p4 = pnand %p3276_p12, %p3270_p9 }
 0x154   : > { %3280 = shalt.err (!%p3277_p4)
}
 0x155   : > { %s4506_s28 = smov 64   ;;  %s3281_s0 = scalar_lea.hbm %s4446_s12, 1024 }
 0x156   : > { %2766 = dma.hbm_to_vmem [thread:$0]  (!%p3726_p6), %s4444_s10, 512, %s577_s30, [#allocation18], %s4506_s28, %s4506_s28, %s3573_s20  }
 0x157   : > { %p3282_p1 = scmp.ne.s32.totalorder %s4446_s12, %s3281_s0  ;;  %p3288_p0 = scmp.lt.u32.totalorder %s3281_s0, %s4446_s12 }
 0x159   : > { %p3284_p3 = pnand %p3282_p1, %p3740_p8 }
 0x15b   : > { %p3285_p13 = pneg %p3284_p3 }
 0x15d   : > { %p3290_p2 = pnand %p3288_p0, %p3285_p13 }
 0x15f   : > { %3293 = shalt.err (!%p3290_p2)
}
 0x160   : > { %s3294_s17 = scalar_lea.vmem %s603_s19, 1024  ;;  %p3302_p10 = scmp.lt.s32.totalorder %s603_s19, %s603_s19 }
 0x161   : > { %p3295_p5 = scmp.ne.s32.totalorder %s603_s19, %s3294_s17  ;;  %p3303_p11 = scmp.lt.s32.totalorder %s3294_s17, %s3294_s17 }
 0x163   : > { %p3297_p7 = pnand %p3295_p5, %p3740_p8  ;;  %p3304_p12 = por %p3303_p11, %p3302_p10 }
 0x165   : > { %p3298_p9 = pneg %p3297_p7 }
 0x167   : > { %p3305_p4 = pnand %p3304_p12, %p3298_p9 }
 0x169   : > { %3308 = shalt.err (!%p3305_p4)
}
 0x16a   : > { %2772 = dma.hbm_to_vmem [thread:$0]  (!%p3726_p6), %s4446_s12, 1024, %s603_s19, [#allocation21], %s4506_s28, %s4506_s28, %s3573_s20  }
 0x16b   : > { %s3578_s29 = smov [#allocation25]   ;;  %s3579_s22 = smov [#allocation28]  }
 0x16c   : > { %s628_s3 = sshll.u32 %s3578_s29, 4  ;;  %s654_s0 = sshll.u32 %s3579_s22, 4  ;;  %s629_s3 = int_to_ptr.vmem [resolvable:$true] %s628_s3  ;;  %s655_s0 = int_to_ptr.vmem [resolvable:$true] %s654_s0 }
 0x16d   : > { %s3309_s25 = scalar_lea.hbm %s4448_s14, 32 }
 0x16e   : > { %p3310_p1 = scmp.ne.s32.totalorder %s4448_s14, %s3309_s25  ;;  %p3316_p0 = scmp.lt.u32.totalorder %s3309_s25, %s4448_s14 }
 0x170   : > { %p3312_p3 = pnand %p3310_p1, %p3740_p8 }
 0x172   : > { %p3313_p13 = pneg %p3312_p3 }
 0x174   : > { %p3318_p2 = pnand %p3316_p0, %p3313_p13 }
 0x176   : > { %3321 = shalt.err (!%p3318_p2)
}
 0x177   : > { %s3322_s19 = scalar_lea.vmem %s629_s3, 32  ;;  %p3330_p10 = scmp.lt.s32.totalorder %s629_s3, %s629_s3 }
 0x178   : > { %p3323_p5 = scmp.ne.s32.totalorder %s629_s3, %s3322_s19  ;;  %p3331_p11 = scmp.lt.s32.totalorder %s3322_s19, %s3322_s19 }
 0x17a   : > { %p3325_p7 = pnand %p3323_p5, %p3740_p8  ;;  %p3332_p12 = por %p3331_p11, %p3330_p10 }
 0x17c   : > { %p3326_p9 = pneg %p3325_p7 }
 0x17e   : > { %p3333_p4 = pnand %p3332_p12, %p3326_p9 }
 0x180   : > { %3336 = shalt.err (!%p3333_p4)
}
 0x181   : > { %2778 = dma.hbm_to_vmem [thread:$0]  (!%p3726_p6), %s4448_s14, 32, %s629_s3, [#allocation24], %s4505_s2, %s4505_s2, %s4504_s27  }
 0x182   : > { %s3337_s18 = scalar_lea.hbm %s4450_s16, 256 }
 0x183   : > { %p3338_p1 = scmp.ne.s32.totalorder %s4450_s16, %s3337_s18  ;;  %p3344_p0 = scmp.lt.u32.totalorder %s3337_s18, %s4450_s16 }
 0x185   : > { %p3340_p3 = pnand %p3338_p1, %p3740_p8 }
 0x187   : > { %p3341_p13 = pneg %p3340_p3 }
 0x189   : > { %p3346_p2 = pnand %p3344_p0, %p3341_p13 }
 0x18b   : > { %3349 = shalt.err (!%p3346_p2)
}
 0x18c   : > { %s3350_s30 = scalar_lea.vmem %s655_s0, 256  ;;  %p3358_p10 = scmp.lt.s32.totalorder %s655_s0, %s655_s0 }
 0x18d   : > { %p3351_p5 = scmp.ne.s32.totalorder %s655_s0, %s3350_s30  ;;  %p3359_p11 = scmp.lt.s32.totalorder %s3350_s30, %s3350_s30 }
 0x18f   : > { %p3353_p7 = pnand %p3351_p5, %p3740_p8  ;;  %p3360_p12 = por %p3359_p11, %p3358_p10 }
 0x191   : > { %p3354_p9 = pneg %p3353_p7 }
 0x193   : > { %p3361_p4 = pnand %p3360_p12, %p3354_p9 }
 0x195   : > { %3364 = shalt.err (!%p3361_p4)
}
 0x196   : > { %2784 = dma.hbm_to_vmem [thread:$0]  (!%p3726_p6), %s4450_s16, 256, %s655_s0, [#allocation27], %s4506_s28, %s4506_s28, %s3573_s20  }
 0x197   : > { %s3580_s3 = smov [#allocation29]   ;;  %s4507_s29 = sld [smem:[#allocation59_spill]] }
 0x198   : > { %s668_s19 = sshll.u32 %s3580_s3, 4  ;;  %s669_s19 = int_to_ptr.vmem [resolvable:$true] %s668_s19 }
 0x19d   : > { %s4508_s22 = smov %s4507_s29  ;;  %s3365_s18 = scalar_lea.hbm %s4507_s29, 16 }
 0x19e   : > { %p3366_p1 = scmp.ne.s32.totalorder %s4508_s22, %s3365_s18  ;;  %p3372_p0 = scmp.lt.u32.totalorder %s3365_s18, %s4508_s22 }
 0x1a0   : > { %p3368_p3 = pnand %p3366_p1, %p3740_p8 }
 0x1a2   : > { %p3369_p13 = pneg %p3368_p3 }
 0x1a4   : > { %p3374_p2 = pnand %p3372_p0, %p3369_p13 }
 0x1a6   : > { %3377 = shalt.err (!%p3374_p2)
}
 0x1a7   : > { %s3378_s20 = scalar_lea.vmem %s669_s19, 16  ;;  %s3385_s28 = scalar_lea.vmem %s669_s19, 32 }
 0x1a8   : > { %p3379_p5 = scmp.ne.s32.totalorder %s669_s19, %s3378_s20  ;;  %p3386_p10 = scmp.lt.s32.totalorder %s669_s19, %s669_s19 }
 0x1a9   : > { %p3387_p11 = scmp.lt.s32.totalorder %s3385_s28, %s3378_s20 }
 0x1aa   : > { %p3381_p7 = pnand %p3379_p5, %p3740_p8 }
 0x1ab   : > { %p3388_p12 = por %p3387_p11, %p3386_p10 }
 0x1ac   : > { %p3382_p9 = pneg %p3381_p7 }
 0x1ae   : > { %p3389_p4 = pnand %p3388_p12, %p3382_p9 }
 0x1b0   : > { %3392 = shalt.err (!%p3389_p4)
}
 0x1b1   : > { %s4509_s27 = sld [smem:[#allocation47_spill]]  ;;  %s4510_s2 = sld [smem:[#allocation46_spill]] }
 0x1b2   : > { %s4511_s3 = sld [smem:[#allocation45_spill]]  ;;  %s4512_s21 = sld [smem:[#allocation44_spill]] }
 0x1b3   : > { %s4513_s4 = sld [smem:[#allocation48_spill]] }
 0x1b4   : > { %2787 = dma.hbm_to_vmem [thread:$0]  (!%p3726_p6), %s4508_s22, 16, %s669_s19, [#allocation30]  }
 0x1b7   : > { %s2391_s26 = sadd.s32 4294967294, %s4509_s27   ;;  %s4084_s30 = sadd.s32 1, %s4509_s27  }
 0x1b8   : > { %s49_s24 = ssub.s32 %s4509_s27, %s4084_s30  ;;  %s52_s29 = sadd.s32 1, %s4510_s2 }
 0x1b9   : > { %p50_p8 = scmp.eq.s32.totalorder %s49_s24, 0  ;;  %p59_p1 = scmp.ne.s32.totalorder %s4510_s2, %s4511_s3 }
 0x1ba   : > { %p60_p3 = scmp.eq.s32.totalorder %s4509_s27, 0  ;;  %p65_p13 = scmp.ne.s32.totalorder %s4511_s3, %s4512_s21 }
 0x1bb   : > { %s4095_s18 = scalar_select %p50_p8, %s4510_s2, %s52_s29  }
 0x1bc   : > { %p4097_p0 = por %p60_p3, %p59_p1  ;;  %p4515_p2 = scmp.eq.s32.totalorder %s4513_s4, 0 }
 0x1bd   : > { %p451_p5 = scmp.eq.s32.totalorder %s4513_s4, 1  ;;  %p457_p7 = scmp.eq.s32.totalorder %s2391_s26, 1 }
 0x1be   : > { %p4103_p6 = por %p4515_p2, %p65_p13  ;;  %p2815_p9 = scmp.lt.s32.totalorder %s4509_s27, 2 }
 0x1bf   : > { %s4110_s25 = sand.u32 1, %s4510_s2   ;;  %p4112_p10 = por %p451_p5, %p59_p1 }
 0x1c0   : > { %s4516_s19 = scalar_select %p4103_p6, 1, 0 }
 0x1c1   : > { %s4517_s23 = scalar_select %p4112_p10, 1, 0 }
 0x1c2   : > { %p4116_p11 = por %p457_p7, %p65_p13  ;;  %s2410_s20 = sshll.u32 %s4110_s25, 3 }
 0x1c3   : > { %s2411_s28 = sshll.u32 %s4509_s27, 7  ;;  %s4519_s21 = sld [smem:[#allocation50_spill]] }
 0x1c4   : > { %s4518_s17 = scalar_select %p4116_p11, 1, 0 }
 0x1c5   : > { %s683_s2 = scalar_lea.vmem [#allocation2], %s2410_s20  ;;  %p4131_p12 = pnand %p2815_p9, %p4097_p0 }
 0x1c6   : > { %s690_s26 = sshll.u32 %s683_s2, 4  ;;  %s680_s5 = scalar_lea.sflag [#allocation3], %s4110_s25  ;;  %s4127_s26 = int_to_ptr.vmem [resolvable:$true] %s690_s26 }
 0x1c7   : > { %p3395_p8 = pneg %p4131_p12 }
 0x1c9   : > { %s4125_s4 = scalar_lea.hbm %s4519_s21, %s2411_s28  ;;  %s3398_s1 = scalar_lea.hbm %s4519_s21, 256 }
 0x1ca   : > { %s3393_s0 = scalar_lea.hbm %s4125_s4, 128  ;;  %p3399_p13 = scmp.lt.u32.totalorder %s4125_s4, %s4519_s21 }
 0x1cb   : > { %p3394_p4 = scmp.ne.s32.totalorder %s4125_s4, %s3393_s0  ;;  %p3400_p0 = scmp.lt.u32.totalorder %s3398_s1, %s3393_s0 }
 0x1cc   : > { %p3402_p5 = scmp.lt.u32.totalorder %s3393_s0, %s4125_s4 }
 0x1cd   : > { %p3396_p1 = pnand %p3395_p8, %p3394_p4  ;;  %p3401_p2 = por %p3400_p0, %p3399_p13 }
 0x1cf   : > { %p3397_p3 = pneg %p3396_p1  ;;  %p3403_p7 = por %p3402_p5, %p3401_p2 }
 0x1d1   : > { %p3404_p9 = pnand %p3403_p7, %p3397_p3 }
 0x1d3   : > { %3407 = shalt.err (!%p3404_p9)
}
 0x1d4   : > { %s3408_s29 = scalar_lea.vmem %s4127_s26, 128  ;;  %s3581_s20 = smov [#allocation2]  }
 0x1d5   : > { %p3409_p4 = scmp.ne.s32.totalorder %s4127_s26, %s3408_s29  ;;  %s3413_s28 = sshll.u32 %s3581_s20, 4  ;;  %s3414_s28 = int_to_ptr.vmem [resolvable:$false] %s3413_s28 }
 0x1d6   : > { %s3415_s3 = scalar_lea.vmem %s3414_s28, 256  ;;  %p3416_p10 = scmp.lt.s32.totalorder %s4127_s26, %s3414_s28 }
 0x1d7   : > { %p3411_p1 = pnand %p3409_p4, %p3395_p8  ;;  %p3417_p13 = scmp.lt.s32.totalorder %s3415_s3, %s3408_s29 }
 0x1d9   : > { %p3412_p11 = pneg %p3411_p1  ;;  %p3418_p0 = por %p3417_p13, %p3416_p10 }
 0x1db   : > { %p3419_p2 = pnand %p3418_p0, %p3412_p11 }
 0x1dd   : > { %3422 = shalt.err (!%p3419_p2)
}
 0x1de   : > { %2791 = dma.hbm_to_vmem [thread:$0]  (!%p4131_p12), %s4125_s4, 128, %s4127_s26, %s680_s5  }
 0x1df   : > { %s2412_s0 = sshll.u32 %s4509_s27, 4  ;;  %s700_s1 = scalar_lea.vmem [#allocation5], %s4110_s25 }
 0x1e0   : > { %s707_s2 = sshll.u32 %s700_s1, 4  ;;  %s4521_s7 = sld [smem:[#allocation51_spill]]  ;;  %s708_s2 = int_to_ptr.vmem [resolvable:$true] %s707_s2 }
 0x1e1   : > { %s4522_s29 = sand.u32 1, %s4509_s27  }
 0x1e2   : > { %s698_s3 = scalar_lea.sflag [#allocation6], %s4522_s29 }
 0x1e6   : > { %s4167_s28 = scalar_lea.hbm %s4521_s7, %s2412_s0  ;;  %s3428_s4 = scalar_lea.hbm %s4521_s7, 32 }
 0x1e7   : > { %s3423_s8 = scalar_lea.hbm %s4167_s28, 16  ;;  %p3429_p5 = scmp.lt.u32.totalorder %s4167_s28, %s4521_s7 }
 0x1e8   : > { %p3424_p10 = scmp.ne.s32.totalorder %s4167_s28, %s3423_s8  ;;  %p3430_p7 = scmp.lt.u32.totalorder %s3428_s4, %s3423_s8 }
 0x1e9   : > { %p3432_p4 = scmp.lt.u32.totalorder %s3423_s8, %s4167_s28 }
 0x1ea   : > { %p3426_p11 = pnand %p3424_p10, %p3395_p8  ;;  %p3431_p9 = por %p3430_p7, %p3429_p5 }
 0x1ec   : > { %p3427_p3 = pneg %p3426_p11  ;;  %p3433_p1 = por %p3432_p4, %p3431_p9 }
 0x1ee   : > { %p3434_p13 = pnand %p3433_p1, %p3427_p3 }
 0x1f0   : > { %3437 = shalt.err (!%p3434_p13)
}
 0x1f1   : > { %s3438_s27 = scalar_lea.vmem %s708_s2, 16  ;;  %s3582_s0 = smov [#allocation5]  }
 0x1f2   : > { %p3439_p0 = scmp.ne.s32.totalorder %s708_s2, %s3438_s27  ;;  %s3443_s1 = sshll.u32 %s3582_s0, 4  ;;  %s3444_s1 = int_to_ptr.vmem [resolvable:$false] %s3443_s1 }
 0x1f3   : > { %s3445_s20 = scalar_lea.vmem %s3444_s1, 32  ;;  %p3446_p11 = scmp.lt.s32.totalorder %s708_s2, %s3444_s1 }
 0x1f4   : > { %p3441_p2 = pnand %p3439_p0, %p3395_p8  ;;  %p3447_p6 = scmp.lt.s32.totalorder %s3445_s20, %s3438_s27 }
 0x1f6   : > { %p3442_p10 = pneg %p3441_p2  ;;  %p3448_p5 = por %p3447_p6, %p3446_p11 }
 0x1f8   : > { %p3449_p7 = pnand %p3448_p5, %p3442_p10 }
 0x1fa   : > { %3452 = shalt.err (!%p3449_p7)
}
 0x1fb   : > { %2794 = dma.hbm_to_vmem [thread:$0]  (!%p4131_p12), %s4167_s28, 16, %s708_s2, %s698_s3  }
 0x1fc   : > { %s4523_s8 = sld [smem:[#allocation49_spill]] }
 0x202   : > { %p4524_p3 = scmp.ne.s32.totalorder %s4523_s8, 0 }
 0x203   : > { %s4525_s29 = sld [smem:[#allocation45_spill]] (!%p4524_p3)  ;;  %p4526_p6 = scmp.ne.s32.totalorder (!%p4524_p3), %s4516_s19, 0 }
 0x204   : > { %716 = sbr.rel (%p4524_p3) target bundleno = 5818 (0x16ba), region = 92 }
 0x209   : > { %s4193_s5 = sand.u32 (!%p4524_p3), 1, %s4525_s29  }
 0x20a   : > { %s2414_s25 = sshll.u32 (!%p4524_p3), %s4193_s5, 3  ;;  %s719_s4 = scalar_lea.sflag (!%p4524_p3), [#allocation3], %s4193_s5 }
 0x20b   : > { %s722_s6 = scalar_lea.vmem [#allocation2], %s2414_s25 }
 0x20c   : > { %3498 = dma.done.wait (%p4526_p6), %s719_s4, 128  }
 0x20d   : > { %3500 = vsyncadd (%p4526_p6), %s719_s4, 4294967168  ;;  %s4527_s24 = sld [smem:[#allocation48_spill]]  ;;  %s730_s3 = scalar_lea.vmem [#allocation5], %s4193_s5 }
 0x213   : > { %s727_s2 = sand.u32 1, %s4527_s24  }
 0x214   : > { %s728_s28 = scalar_lea.sflag [#allocation6], %s727_s2 }
 0x215   : > { %3502 = dma.done.wait (%p4526_p6), %s728_s28, 16  }
 0x216   : > { %3504 = vsyncadd (%p4526_p6), %s728_s28, 4294967280  ;;  %p4528_p12 = scmp.eq.s32.totalorder %s4527_s24, 0 }
 0x218   : > { %3506 = dma.done.wait (%p4528_p12), [#allocation6], 16   ;;  %p4529_p8 = pmov %p4528_p12 }
 0x21a   : > { %3508 = vsyncadd (%p4529_p8), [#allocation6], 4294967280  ;;  %p4530_p9 = pmov %p4529_p8 }
 0x21b   : > { %p4531_p4 = pmov %p4529_p8 }
 0x21c   : > { %3510 = dma.done.wait (%p4530_p9), [#allocation9], 528  }
 0x21d   : > { %3512 = vsyncadd (%p4531_p4), [#allocation9], 4294966768  ;;  %p4532_p1 = pmov %p4531_p4 }
 0x21f   : > { %3514 = dma.done.wait (%p4532_p1), [#allocation12], 544   ;;  %p4533_p13 = pmov %p4532_p1 }
 0x220   : > { %p4534_p0 = pmov %p4532_p1 }
 0x221   : > { %3516 = vsyncadd (%p4533_p13), [#allocation12], 4294966752 }
 0x222   : > { %3518 = dma.done.wait (%p4534_p0), [#allocation15], 64   ;;  %p4535_p2 = pmov %p4534_p0 }
 0x223   : > { %p4536_p10 = pmov %p4534_p0 }
 0x224   : > { %3520 = vsyncadd (%p4535_p2), [#allocation15], 4294967232 }
 0x225   : > { %3522 = dma.done.wait (%p4536_p10), [#allocation18], 544   ;;  %p4537_p11 = pmov %p4534_p0 }
 0x226   : > { %p4538_p5 = pmov %p4534_p0 }
 0x227   : > { %3524 = vsyncadd (%p4537_p11), [#allocation18], 4294966752 }
 0x228   : > { %3526 = dma.done.wait (%p4538_p5), [#allocation21], 1056   ;;  %p4539_p7 = pmov %p4534_p0 }
 0x229   : > { %p4540_p3 = pmov %p4534_p0 }
 0x22a   : > { %3528 = vsyncadd (%p4539_p7), [#allocation21], 4294966240 }
 0x22b   : > { %3530 = dma.done.wait (%p4540_p3), [#allocation24], 64   ;;  %p4541_p6 = pmov %p4534_p0 }
 0x22c   : > { %p4542_p12 = pmov %p4534_p0 }
 0x22d   : > { %3532 = vsyncadd (%p4541_p6), [#allocation24], 4294967232 }
 0x22e   : > { %3534 = dma.done.wait (%p4542_p12), [#allocation27], 288   ;;  %p4543_p8 = pmov %p4534_p0 }
 0x22f   : > { %p4544_p9 = pmov %p4534_p0 }
 0x230   : > { %3536 = vsyncadd (%p4543_p8), [#allocation27], 4294967008 }
 0x231   : > { %3538 = dma.done.wait (%p4544_p9), [#allocation30], 16   ;;  %p4545_p4 = pmov %p4534_p0 }
 0x232   : > { %vm855_vm0 = vcmask 261120   ;;  %v852_v0 = vld [vmem:[%s722_s6] sm:$0xff]  ;;  %v2893_v7 = vld [vmem:[#allocation10] sm:$0xff]   ;;  %v3583_v8 = vmov 0.0   ;;  %vm3584_vm1 = vmmov 0   ;;  %s3585_s19 = smov 112   ;;  %v888_v32 = vlaneseq }
 0x233   : > { %3540 = vsyncadd (%p4545_p4), [#allocation30], 4294967280  ;;  %v856_v1 = vsel %vm855_vm0, %v852_v0, 0.0  ;;  %2541 = vmatprep.subr.bf16.mxu0 %v3583_v8  ;;  %2549 = vmatprep.subr.bf16.mxu1 %v3583_v8  ;;  %v2894_v9 = vld [vmem:[#allocation10 + $0x8] sm:$0xff]   ;;  %v2432_v14 = vld [vmem:[#allocation7] ss:$0 sm:$0xff] }
 0x234   : > { %857 = vadd.xlane.f32.xlu0 %v856_v1  ;;  %2542 = vmatpush3.bf16.msra.mxu0 %v2893_v7  ;;  %v2433_v16 = vld [vmem:[#allocation8] ss:$0 sm:$0xff]  ;;  %v2434_v20 = vld [vmem:[#allocation11] ss:$0 sm:$0xff]  ;;  %s3586_s26 = smov 96   ;;  %s3587_s27 = smov 80  }
 0x235   : > { %2545 = vmatprep.mubr.msk.bf16.mxu0 %vm3584_vm1, %v3583_v8  ;;  %2543 = vmatprep.subr.bf16.mxu0 %v3583_v8  ;;  %vm964_vm2 = vcmask 130048   ;;  %v884_v33 = vld [vmem:[%s730_s3] sm:$0x1]  ;;  %v889_v35 = vshrl.u32 %v888_v32, 7  ;;  %vm1011_vm3 = vcmask 64512   ;;  %s3588_s0 = smov 64  }
 0x236   : > { %2551 = vmatprep.mubr.msk.bf16.mxu1 %vm3584_vm1, %v3583_v8  ;;  %v885_v34 = vsub.f32 1.0, %v884_v33  ;;  %s3589_s1 = smov 48   ;;  %vm1027_vm4 = vcmask 1043456   ;;  %s3590_s20 = smov 16   ;;  %vm1402_vm5 = vcmask 523264  }
 0x237   : > { %v890_v37 = vsub.s32 0, %v889_v35  ;;  %s2491_s8 = sshll.u32 %s4527_s24, 7  ;;  %s850_s29 = scalar_lea.vmem [#allocation31], %s2414_s25 }
 0x238   : > { %2544 = vmatpush3.bf16.msra.mxu0 %v2894_v9  ;;  %v886_v36 = vmul.f32 -1e+09, %v885_v34  ;;  %s2149_s4 = sshll.u32 %s850_s29, 4  ;;  %s4546_s28 = sld [smem:[#allocation60_spill]]  ;;  %s4392_s4 = int_to_ptr.vmem [resolvable:$true] %s2149_s4 }
 0x239   : > { %2555 = vmatprep.subr.bf16.mxu0 %v3583_v8  ;;  %s2136_s24 = scalar_lea.sflag [#allocation4], %s4193_s5  ;;  %p4548_p13 = scmp.ne.s32.totalorder %s4517_s23, 0 }
 0x23a   : > { %v4277_v38 = vrot.slane %v886_v36, %v890_v37  ;;  %s3591_s25 = smov [#allocation31]  }
 0x23e   : > { %s4547_s3 = smov %s4546_s28 }
 0x2c1   : > { %v858_v2 = vpop.xlane.xlu0 %857 }
 0x2c2   : > { %v860_v3 = vmul.f32 0.03125, %v858_v2 }
 0x2c4   : > { %v861_v4 = vsub.f32 %v852_v0, %v860_v3  ;;  %v2895_v3 = vld [vmem:[#allocation13] sm:$0xff]  }
 0x2c6   : > { %v862_v5 = vmul.f32 %v861_v4, %v861_v4 }
 0x2c8   : > { %v863_v6 = vsel %vm855_vm0, %v862_v5, 0.0 }
 0x2c9   : > { %864 = vadd.xlane.f32.xlu0 %v863_v6 }
 0x356   : > { %v865_v10 = vpop.xlane.xlu0 %864 }
 0x357   : > { %v866_v11 = vmul.f32 0.03125, %v865_v10 }
 0x359   : > { %v867_v12 = vadd.f32 1e-12, %v866_v11 }
 0x35b   : > { %2915 = vrsqrt.f32 %v867_v12 }
 0x365   : > { %v2916_v13 = vpop.eup %2915 }
 0x366   : > { %v869_v15 = vmul.f32 %v2916_v13, %v861_v4  ;;  %v2896_v4 = vld [vmem:[#allocation13 + $0x8] sm:$0xff]  }
 0x368   : > { %v876_v17 = vmul.f32 %v2432_v14, %v869_v15 }
 0x36a   : > { %v4255_v18 = vadd.f32 %v2433_v16, %v876_v17 }
 0x36c   : > { %v893_v19 = vpack.c.bf16 %v4255_v18, %v4255_v18 }
 0x36e   : > { %2546 = vmatmul.mubr.msk.bf16.vlgmr.msra.gmra.mrb[0].mxu0 %vm855_vm0, %v893_v19 }
 0x36f   : > { %2557 = vmatprep.mubr.msk.bf16.mxu0 %vm3584_vm1, %v3583_v8 }
 0x441   : > { %v954_v21 = vpop.f32.mrb[0].mxu0 }
 0x442   : > { %v955_v22 = vadd.f32 %v2434_v20, %v954_v21  ;;  %v2547_v23 = vpop.f32.mrb[1].mxu0 }
 0x443   : > { %v957_v24 = vpop.f32.mrb[2].mxu0 }
 0x444   : > { %v960_v25 = vpack.c.bf16 %v955_v22, %v955_v22  ;;  %v2548_v26 = vpop.f32.mrb[3].mxu0 }
 0x446   : > { %1074 = vrot.lane.b32.xlu0 %v960_v25, %s3585_s19  ;;  %962 = vrot.lane.b32.xlu1 %v960_v25, %s3586_s26 }
 0x44a   : > { %1076 = vrot.lane.b32.xlu1 %v960_v25, %s3587_s27 }
 0x4b8   : > { %v963_v27 = vpop.permute.xlu1 %962  ;;  %v1075_v31 = vpop.permute.xlu0 %1074 }
 0x4b9   : > { %v969_v28 = vsel %vm964_vm2, %v963_v27, 0 }
 0x4ba   : > { %2550 = vmatpush3.bf16.xpose.msra.mxu1 %v969_v28 }
 0x4bb   : > { %2561 = vmatprep.subr.bf16.mxu1 %v3583_v8 }
 0x4bc   : > { %v1077_v29 = vpop.permute.xlu1 %1076 }
 0x4bd   : > { %v1082_v30 = vsel %vm964_vm2, %v1077_v29, 0 }
 0x4c1   : > { %2552 = vmatmul.mubr.msk.bf16.vlgmr.msra.gmra.mrb[0].mxu1 %vm964_vm2, %v960_v25 }
 0x4c2   : > { %2562 = vmatpush3.bf16.xpose.msra.mxu1 %v1082_v30  ;;  %2563 = vmatprep.mubr.msk.bf16.mxu1 %vm3584_vm1, %v3583_v8 }
 0x4c3   : > { %2573 = vmatprep.subr.bf16.mxu1 %v3583_v8 }
 0x4c9   : > { %2564 = vmatmul.mubr.msk.bf16.vlgmr.msra.gmra.mrb[4].mxu1 %vm964_vm2, %v1075_v31 }
 0x4ca   : > { %2577 = vmatprep.mubr.msk.bf16.mxu1 %vm3584_vm1, %v3583_v8  ;;  %2574 = vmatpush3.bf16.msra.mxu1 %v2895_v3 }
 0x4cb   : > { %2575 = vmatprep.subr.bf16.mxu1 %v3583_v8 }
 0x4ce   : > { %2576 = vmatpush3.bf16.msra.mxu1 %v2896_v4 }
 0x4cf   : > { %2589 = vmatprep.subr.bf16.mxu1 %v3583_v8 }
 0x594   : > { %v1005_v39 = vpop.f32.mrb[0].mxu1 }
 0x595   : > { %v1006_v40 = vadd.f32 %v1005_v39, %v4277_v38  ;;  %v2553_v41 = vpop.f32.mrb[1].mxu1  ;;  %v2897_v39 = vld [vmem:[#allocation19] sm:$0xff]  }
 0x596   : > { %v1008_v42 = vpop.f32.mrb[2].mxu1 }
 0x597   : > { %v2554_v43 = vpop.f32.mrb[3].mxu1  ;;  %v1012_v44 = vsel %vm1011_vm3, %v1006_v40, -inf }
 0x598   : > { %1013 = vmax.xlane.f32.xlu1 %v1012_v44  ;;  %v2446_v44 = vld [vmem:[#allocation16] ss:$0 sm:$0xff] }
 0x59c   : > { %v1118_v45 = vpop.f32.mrb[4].mxu1 }
 0x59d   : > { %v1119_v46 = vadd.f32 %v1118_v45, %v4277_v38  ;;  %v2565_v47 = vpop.f32.mrb[5].mxu1 }
 0x59e   : > { %v1121_v48 = vpop.f32.mrb[6].mxu1 }
 0x59f   : > { %v2566_v49 = vpop.f32.mrb[7].mxu1  ;;  %v1124_v50 = vsel %vm1011_vm3, %v1119_v46, -inf }
 0x5a0   : > { %1125 = vmax.xlane.f32.xlu0 %v1124_v50  ;;  %v2899_v50 = vld [vmem:[#allocation22] sm:$0xff]  }
 0x5a9   : > { %1022 = vrot.lane.b32.xlu1 %v960_v25, %s3588_s0 }
 0x5b6   : > { %1134 = vrot.lane.b32.xlu0 %v960_v25, %s3589_s1  ;;  %v2442_v25 = vld [vmem:[#allocation14] ss:$0 sm:$0xff] }
 0x625   : > { %v1014_v51 = vpop.xlane.xlu1 %1013 }
 0x626   : > { %v1015_v52 = vsub.f32 %v1006_v40, %v1014_v51  ;;  %v2898_v40 = vld [vmem:[#allocation19 + $0x8] sm:$0xff]  }
 0x627   : > { %v2900_v51 = vld [vmem:[#allocation22 + $0x8] sm:$0xff]  }
 0x628   : > { %v1016_v53 = vmul.f32 1.442695, %v1015_v52  ;;  %v2901_v52 = vld [vmem:[#allocation22 + $0x10] sm:$0xff]  }
 0x629   : > { %v1023_v54 = vpop.permute.xlu1 %1022 }
 0x62a   : > { %2917 = vpow2.f32 %v1016_v53  ;;  %v1029_v55 = vsel %vm1027_vm4, %v1023_v54, 0  ;;  %v2902_v53 = vld [vmem:[#allocation22 + $0x18] sm:$0xff]  }
 0x62b   : > { %2556 = vmatpush3.bf16.msra.mxu0 %v1029_v55  ;;  %v2448_v54 = vld [vmem:[#allocation20] ss:$0 sm:$0xff] }
 0x62c   : > { %2567 = vmatprep.subr.bf16.mxu0 %v3583_v8 }
 0x62d   : > { %v1126_v56 = vpop.xlane.xlu0 %1125 }
 0x62e   : > { %v1127_v57 = vsub.f32 %v1119_v46, %v1126_v56  ;;  %v2447_v46 = vld [vmem:[#allocation17] ss:$0 sm:$0xff] }
 0x630   : > { %v1128_v58 = vmul.f32 1.442695, %v1127_v57 }
 0x631   : > { %v1135_v60 = vpop.permute.xlu0 %1134 }
 0x632   : > { %2919 = vpow2.f32 %v1128_v58  ;;  %v1140_v63 = vsel %vm1027_vm4, %v1135_v60, 0 }
 0x634   : > { %v2918_v59 = vpop.eup %2917 }
 0x635   : > { %v1018_v61 = vsel %vm1011_vm3, %v2918_v59, 0.0  ;;  %v1021_v62 = vpack.c.bf16 %v2918_v59, %v2918_v59 }
 0x636   : > { %1019 = vadd.xlane.f32.xlu0 %v1018_v61 }
 0x637   : > { %2558 = vmatmul.mubr.msk.bf16.vlgmr.msra.gmra.mrb[4].mxu0 %vm1011_vm3, %v1021_v62 }
 0x638   : > { %2568 = vmatpush3.bf16.msra.mxu0 %v1140_v63  ;;  %2569 = vmatprep.mubr.msk.bf16.mxu0 %vm3584_vm1, %v3583_v8 }
 0x639   : > { %2581 = vmatprep.subr.bf16.mxu0 %v3583_v8 }
 0x63c   : > { %v2920_v0 = vpop.eup %2919 }
 0x63d   : > { %v1130_v1 = vsel %vm1011_vm3, %v2920_v0, 0.0  ;;  %v1133_v2 = vpack.c.bf16 %v2920_v0, %v2920_v0 }
 0x63e   : > { %1131 = vadd.xlane.f32.xlu1 %v1130_v1 }
 0x63f   : > { %2570 = vmatmul.mubr.msk.bf16.vlgmr.msra.gmra.mrb[8].mxu0 %vm1011_vm3, %v1133_v2 }
 0x640   : > { %2585 = vmatprep.mubr.msk.bf16.mxu0 %vm3584_vm1, %v3583_v8  ;;  %2582 = vmatpush3.bf16.msra.mxu0 %v2897_v39 }
 0x641   : > { %2583 = vmatprep.subr.bf16.mxu0 %v3583_v8 }
 0x644   : > { %2584 = vmatpush3.bf16.msra.mxu0 %v2898_v40 }
 0x645   : > { %2601 = vmatprep.subr.bf16.mxu0 %v3583_v8 }
 0x6c3   : > { %v1020_v19 = vpop.xlane.xlu0 %1019 }
 0x6cb   : > { %v1132_v5 = vpop.xlane.xlu1 %1131 }
 0x6cc   : > { %2921 = vrcp.f32 %v1132_v5 }
 0x6cd   : > { %2923 = vrcp.f32 %v1020_v19 }
 0x6d6   : > { %v2922_v11 = vpop.eup %2921 }
 0x6d7   : > { %v2924_v20 = vpop.eup %2923 }
 0x70a   : > { %v1065_v6 = vpop.f32.mrb[4].mxu0 }
 0x70b   : > { %v2559_v7 = vpop.f32.mrb[5].mxu0  ;;  %v1072_v21 = vmul.f32 %v2924_v20, %v1065_v6  ;;  %v2452_v6 = vld [vmem:[#allocation23] ss:$0 sm:$0xff] }
 0x70c   : > { %v1068_v9 = vpop.f32.mrb[6].mxu0 }
 0x70d   : > { %v2560_v10 = vpop.f32.mrb[7].mxu0  ;;  %v1073_v22 = vpack.c.bf16 %v1072_v21, %v1072_v21  ;;  %v2903_v21 = vld [vmem:[#allocation10 + $0x10] sm:$0xff]  }
 0x712   : > { %v1176_v12 = vpop.f32.mrb[8].mxu0 }
 0x713   : > { %v1183_v13 = vmul.f32 %v2922_v11, %v1176_v12  ;;  %v2571_v14 = vpop.f32.mrb[9].mxu0 }
 0x714   : > { %v1179_v15 = vpop.f32.mrb[10].mxu0 }
 0x715   : > { %v1184_v16 = vpack.c.bf16 %v1183_v13, %v1183_v13  ;;  %v2572_v17 = vpop.f32.mrb[11].mxu0 }
 0x717   : > { %1186 = vrot.lane.b32.xlu1 %v1184_v16, %s3590_s20 }
 0x789   : > { %v1187_v23 = vpop.permute.xlu1 %1186 }
 0x78a   : > { %v1190_v24 = vsel %vm964_vm2, %v1073_v22, %v1187_v23  ;;  %v2904_v22 = vld [vmem:[#allocation10 + $0x18] sm:$0xff]  }
 0x78b   : > { %2578 = vmatmul.mubr.msk.bf16.vlgmr.msra.gmra.mrb[8].mxu1 %vm855_vm0, %v1190_v24 }
 0x78c   : > { %2597 = vmatprep.mubr.msk.bf16.mxu1 %vm3584_vm1, %v3583_v8  ;;  %2590 = vmatpush3.bf16.msra.mxu1 %v2899_v50 }
 0x78d   : > { %2591 = vmatprep.subr.bf16.mxu1 %v3583_v8 }
 0x790   : > { %2592 = vmatpush3.bf16.msra.mxu1 %v2900_v51 }
 0x791   : > { %2593 = vmatprep.subr.bf16.mxu1 %v3583_v8 }
 0x794   : > { %2594 = vmatpush3.bf16.msra.mxu1 %v2901_v52 }
 0x795   : > { %2595 = vmatprep.subr.bf16.mxu1 %v3583_v8 }
 0x798   : > { %2596 = vmatpush3.bf16.msra.mxu1 %v2902_v53 }
 0x799   : > { %2615 = vmatprep.subr.bf16.mxu1 %v3583_v8 }
 0x85e   : > { %v1250_v26 = vpop.f32.mrb[8].mxu1 }
 0x85f   : > { %v1251_v27 = vadd.f32 %v2442_v25, %v1250_v26  ;;  %v2579_v28 = vpop.f32.mrb[9].mxu1 }
 0x860   : > { %v1253_v29 = vpop.f32.mrb[10].mxu1 }
 0x861   : > { %v2580_v30 = vpop.f32.mrb[11].mxu1  ;;  %v1256_v31 = vadd.f32 %v1251_v27, %v4255_v18  ;;  %v2458_v27 = vld [vmem:[#allocation25] ss:$0 sm:$0xff]  ;;  %v2459_v29 = vld [vmem:[#allocation26] ss:$0 sm:$0xff] }
 0x863   : > { %v1259_v32 = vsel %vm855_vm0, %v1256_v31, 0.0 }
 0x864   : > { %1260 = vadd.xlane.f32.xlu0 %v1259_v32 }
 0x8f1   : > { %v1261_v33 = vpop.xlane.xlu0 %1260 }
 0x8f2   : > { %v1262_v34 = vmul.f32 0.03125, %v1261_v33  ;;  %v2460_v33 = vld [vmem:[#allocation11 + $0x1] ss:$0 sm:$0xff] }
 0x8f4   : > { %v1263_v35 = vsub.f32 %v1256_v31, %v1262_v34 }
 0x8f6   : > { %v1264_v36 = vmul.f32 %v1263_v35, %v1263_v35 }
 0x8f8   : > { %v1265_v37 = vsel %vm855_vm0, %v1264_v36, 0.0 }
 0x8f9   : > { %1266 = vadd.xlane.f32.xlu1 %v1265_v37 }
 0x986   : > { %v1267_v41 = vpop.xlane.xlu1 %1266 }
 0x987   : > { %v1268_v18 = vmul.f32 0.03125, %v1267_v41 }
 0x989   : > { %v1269_v42 = vadd.f32 1e-12, %v1268_v18 }
 0x98b   : > { %2925 = vrsqrt.f32 %v1269_v42 }
 0x995   : > { %v2926_v43 = vpop.eup %2925 }
 0x996   : > { %v1271_v45 = vmul.f32 %v2926_v43, %v1263_v35 }
 0x998   : > { %v1278_v47 = vmul.f32 %v2446_v44, %v1271_v45 }
 0x99a   : > { %v1285_v48 = vadd.f32 %v2447_v46, %v1278_v47 }
 0x99c   : > { %v1286_v49 = vpack.c.bf16 %v1285_v48, %v1285_v48 }
 0x99e   : > { %2586 = vmatmul.mubr.msk.bf16.vlgmr.msra.gmra.mrb[12].mxu0 %vm855_vm0, %v1286_v49 }
 0x99f   : > { %2605 = vmatprep.mubr.msk.bf16.mxu0 %vm3584_vm1, %v3583_v8  ;;  %2602 = vmatpush3.bf16.msra.mxu0 %v2903_v21 }
 0x9a0   : > { %2603 = vmatprep.subr.bf16.mxu0 %v3583_v8 }
 0x9a3   : > { %2604 = vmatpush3.bf16.msra.mxu0 %v2904_v22 }
 0x9a4   : > { %2609 = vmatprep.subr.bf16.mxu0 %v3583_v8 }
 0xa71   : > { %v1347_v55 = vpop.f32.mrb[12].mxu0 }
 0xa72   : > { %v1348_v56 = vadd.f32 %v2448_v54, %v1347_v55  ;;  %v2587_v57 = vpop.f32.mrb[13].mxu0 }
 0xa73   : > { %v1350_v58 = vpop.f32.mrb[14].mxu0 }
 0xa74   : > { %v1354_v59 = vmul.f32 0.044715, %v1348_v56  ;;  %v2588_v60 = vpop.f32.mrb[15].mxu0  ;;  %v1353_v2 = vmul.f32 0.5, %v1348_v56 }
 0xa76   : > { %v1355_v61 = vmul.f32 %v1354_v59, %v1348_v56 }
 0xa78   : > { %v1356_v62 = vmul.f32 %v1355_v61, %v1348_v56 }
 0xa7a   : > { %v1357_v63 = vadd.f32 %v1356_v62, %v1348_v56 }
 0xa7c   : > { %v1358_v0 = vmul.f32 0.7978846, %v1357_v63 }
 0xa7e   : > { %2927 = vtanh.f32 %v1358_v0 }
 0xa88   : > { %v2928_v1 = vpop.eup %2927 }
 0xa89   : > { %v1360_v3 = vadd.f32 1.0, %v2928_v1 }
 0xa8b   : > { %v1361_v4 = vmul.f32 %v1360_v3, %v1353_v2 }
 0xa8d   : > { %v1362_v5 = vpack.c.bf16 %v1361_v4, %v1361_v4 }
 0xa8f   : > { %2598 = vmatmul.mubr.msk.bf16.vlgmr.msra.gmra.mrb[12].mxu1 %vm1402_vm5, %v1362_v5 }
 0xa90   : > { %2617 = vmatprep.mubr.msk.bf16.mxu1 %vm3584_vm1, %v3583_v8 }
 0xb62   : > { %v1440_v7 = vpop.f32.mrb[12].mxu1 }
 0xb63   : > { %v1441_v9 = vadd.f32 %v2452_v6, %v1440_v7  ;;  %v2599_v10 = vpop.f32.mrb[13].mxu1 }
 0xb64   : > { %v1443_v11 = vpop.f32.mrb[14].mxu1  ;;  %v2906_v10 = vld [vmem:[#allocation13 + $0x18] sm:$0xff]  }
 0xb65   : > { %v2600_v12 = vpop.f32.mrb[15].mxu1  ;;  %v1446_v13 = vadd.f32 %v1441_v9, %v1285_v48  ;;  %v2905_v9 = vld [vmem:[#allocation13 + $0x10] sm:$0xff]  }
 0xb67   : > { %v1449_v14 = vsel %vm855_vm0, %v1446_v13, 0.0 }
 0xb68   : > { %1450 = vadd.xlane.f32.xlu0 %v1449_v14 }
 0xbf5   : > { %v1451_v15 = vpop.xlane.xlu0 %1450 }
 0xbf6   : > { %v1452_v16 = vmul.f32 0.03125, %v1451_v15 }
 0xbf8   : > { %v1453_v17 = vsub.f32 %v1446_v13, %v1452_v16 }
 0xbfa   : > { %v1454_v19 = vmul.f32 %v1453_v17, %v1453_v17 }
 0xbfc   : > { %v1455_v20 = vsel %vm855_vm0, %v1454_v19, 0.0 }
 0xbfd   : > { %1456 = vadd.xlane.f32.xlu0 %v1455_v20 }
 0xc8a   : > { %v1457_v23 = vpop.xlane.xlu0 %1456 }
 0xc8b   : > { %v1458_v24 = vmul.f32 0.03125, %v1457_v23 }
 0xc8d   : > { %v1459_v25 = vadd.f32 1e-12, %v1458_v24 }
 0xc8f   : > { %2929 = vrsqrt.f32 %v1459_v25 }
 0xc99   : > { %v2930_v26 = vpop.eup %2929 }
 0xc9a   : > { %v1461_v28 = vmul.f32 %v2930_v26, %v1453_v17 }
 0xc9c   : > { %v1468_v30 = vmul.f32 %v2458_v27, %v1461_v28 }
 0xc9e   : > { %v4323_v31 = vadd.f32 %v2459_v29, %v1468_v30  ;;  %v2468_v30 = vld [vmem:[#allocation14 + $0x1] ss:$0 sm:$0xff] }
 0xca0   : > { %v1476_v32 = vpack.c.bf16 %v4323_v31, %v4323_v31 }
 0xca2   : > { %2606 = vmatmul.mubr.msk.bf16.vlgmr.msra.gmra.mrb[16].mxu0 %vm855_vm0, %v1476_v32 }
 0xca3   : > { %2611 = vmatprep.mubr.msk.bf16.mxu0 %vm3584_vm1, %v3583_v8 }
 0xd75   : > { %v1539_v34 = vpop.f32.mrb[16].mxu0 }
 0xd76   : > { %v1540_v35 = vadd.f32 %v2460_v33, %v1539_v34  ;;  %v2607_v36 = vpop.f32.mrb[17].mxu0 }
 0xd77   : > { %v1542_v37 = vpop.f32.mrb[18].mxu0 }
 0xd78   : > { %v1545_v39 = vpack.c.bf16 %v1540_v35, %v1540_v35  ;;  %v2608_v40 = vpop.f32.mrb[19].mxu0 }
 0xd7a   : > { %1656 = vrot.lane.b32.xlu1 %v1545_v39, %s3585_s19  ;;  %1547 = vrot.lane.b32.xlu0 %v1545_v39, %s3586_s26  ;;  %s4390_s19 = scalar_lea.hbm %s4546_s28, %s2491_s8  ;;  %s3453_s26 = scalar_lea.vmem %s4392_s4, 128 }
 0xd7b   : > { %p3454_p1 = scmp.ne.s32.totalorder %s4392_s4, %s3453_s26 }
 0xd7d   : > { %p3455_p0 = pnand %p3454_p1, %p4548_p13 }
 0xd7e   : > { %1658 = vrot.lane.b32.xlu0 %v1545_v39, %s3587_s27  ;;  %s3457_s27 = sshll.u32 %s3591_s25, 4  ;;  %s3458_s27 = int_to_ptr.vmem [resolvable:$false] %s3457_s27 }
 0xd7f   : > { %p3456_p2 = pneg %p3455_p0  ;;  %p3460_p10 = scmp.lt.s32.totalorder %s4392_s4, %s3458_s27 }
 0xdec   : > { %v1548_v41 = vpop.permute.xlu0 %1547  ;;  %v1657_v44 = vpop.permute.xlu1 %1656 }
 0xded   : > { %v1553_v18 = vsel %vm964_vm2, %v1548_v41, 0 }
 0xdee   : > { %2610 = vmatpush3.bf16.xpose.msra.mxu0 %v1553_v18 }
 0xdef   : > { %2621 = vmatprep.subr.bf16.mxu0 %v3583_v8 }
 0xdf0   : > { %v1659_v42 = vpop.permute.xlu0 %1658 }
 0xdf1   : > { %v1664_v43 = vsel %vm964_vm2, %v1659_v42, 0 }
 0xdf5   : > { %2612 = vmatmul.mubr.msk.bf16.vlgmr.msra.gmra.mrb[20].mxu0 %vm964_vm2, %v1545_v39 }
 0xdf6   : > { %2622 = vmatpush3.bf16.xpose.msra.mxu0 %v1664_v43  ;;  %2623 = vmatprep.mubr.msk.bf16.mxu0 %vm3584_vm1, %v3583_v8 }
 0xdf7   : > { %2633 = vmatprep.subr.bf16.mxu0 %v3583_v8 }
 0xdfd   : > { %2624 = vmatmul.mubr.msk.bf16.vlgmr.msra.gmra.mrb[24].mxu0 %vm964_vm2, %v1657_v44  ;;  %v2907_v44 = vld [vmem:[#allocation19 + $0x10] sm:$0xff]  }
 0xdfe   : > { %2637 = vmatprep.mubr.msk.bf16.mxu0 %vm3584_vm1, %v3583_v8  ;;  %2634 = vmatpush3.bf16.msra.mxu0 %v2905_v9 }
 0xdff   : > { %2635 = vmatprep.subr.bf16.mxu0 %v3583_v8 }
 0xe02   : > { %2636 = vmatpush3.bf16.msra.mxu0 %v2906_v10 }
 0xe03   : > { %2649 = vmatprep.subr.bf16.mxu0 %v3583_v8 }
 0xec8   : > { %v1589_v45 = vpop.f32.mrb[20].mxu0 }
 0xec9   : > { %v1590_v46 = vadd.f32 %v1589_v45, %v4277_v38  ;;  %v2613_v47 = vpop.f32.mrb[21].mxu0  ;;  %v2908_v45 = vld [vmem:[#allocation19 + $0x18] sm:$0xff]  }
 0xeca   : > { %v1592_v48 = vpop.f32.mrb[22].mxu0 }
 0xecb   : > { %v2614_v49 = vpop.f32.mrb[23].mxu0  ;;  %v1595_v50 = vsel %vm1011_vm3, %v1590_v46, -inf }
 0xecc   : > { %1596 = vmax.xlane.f32.xlu0 %v1595_v50  ;;  %v2472_v49 = vld [vmem:[#allocation16 + $0x1] ss:$0 sm:$0xff] }
 0xed0   : > { %v1700_v51 = vpop.f32.mrb[24].mxu0 }
 0xed1   : > { %v1701_v52 = vadd.f32 %v1700_v51, %v4277_v38  ;;  %v2625_v53 = vpop.f32.mrb[25].mxu0  ;;  %v2473_v51 = vld [vmem:[#allocation17 + $0x1] ss:$0 sm:$0xff] }
 0xed2   : > { %v1703_v54 = vpop.f32.mrb[26].mxu0 }
 0xed3   : > { %v2626_v55 = vpop.f32.mrb[27].mxu0  ;;  %v1706_v56 = vsel %vm1011_vm3, %v1701_v52, -inf }
 0xed4   : > { %1707 = vmax.xlane.f32.xlu1 %v1706_v56  ;;  %v2909_v55 = vld [vmem:[#allocation22 + $0x20] sm:$0xff]   ;;  %v2910_v56 = vld [vmem:[#allocation22 + $0x28] sm:$0xff]  }
 0xee2   : > { %1605 = vrot.lane.b32.xlu0 %v1545_v39, %s3588_s0  ;;  %s3459_s0 = scalar_lea.vmem %s3458_s27, 256 }
 0xee3   : > { %p3461_p11 = scmp.lt.s32.totalorder %s3459_s0, %s3453_s26 }
 0xee5   : > { %1716 = vrot.lane.b32.xlu1 %v1545_v39, %s3589_s1  ;;  %p3462_p5 = por %p3461_p11, %p3460_p10 }
 0xee7   : > { %p3463_p7 = pnand %p3462_p5, %p3456_p2 }
 0xf59   : > { %v1597_v57 = vpop.xlane.xlu0 %1596 }
 0xf5a   : > { %v1598_v58 = vsub.f32 %v1590_v46, %v1597_v57  ;;  %v2911_v57 = vld [vmem:[#allocation22 + $0x30] sm:$0xff]  }
 0xf5c   : > { %v1599_v59 = vmul.f32 1.442695, %v1598_v58  ;;  %v2912_v58 = vld [vmem:[#allocation22 + $0x38] sm:$0xff]  }
 0xf5d   : > { %v1606_v60 = vpop.permute.xlu0 %1605 }
 0xf5e   : > { %2931 = vpow2.f32 %v1599_v59  ;;  %v1611_v61 = vsel %vm1027_vm4, %v1606_v60, 0  ;;  %v2474_v59 = vld [vmem:[#allocation20 + $0x1] ss:$0 sm:$0xff] }
 0xf5f   : > { %2616 = vmatpush3.bf16.msra.mxu1 %v1611_v61 }
 0xf60   : > { %2627 = vmatprep.subr.bf16.mxu1 %v3583_v8 }
 0xf61   : > { %v1708_v38 = vpop.xlane.xlu1 %1707 }
 0xf62   : > { %v1709_v62 = vsub.f32 %v1701_v52, %v1708_v38 }
 0xf64   : > { %v1710_v63 = vmul.f32 1.442695, %v1709_v62 }
 0xf65   : > { %v1717_v1 = vpop.permute.xlu1 %1716 }
 0xf66   : > { %2933 = vpow2.f32 %v1710_v63  ;;  %v1722_v4 = vsel %vm1027_vm4, %v1717_v1, 0 }
 0xf68   : > { %v2932_v0 = vpop.eup %2931 }
 0xf69   : > { %v1601_v2 = vsel %vm1011_vm3, %v2932_v0, 0.0  ;;  %v1604_v3 = vpack.c.bf16 %v2932_v0, %v2932_v0 }
 0xf6a   : > { %1602 = vadd.xlane.f32.xlu1 %v1601_v2 }
 0xf6b   : > { %2618 = vmatmul.mubr.msk.bf16.vlgmr.msra.gmra.mrb[16].mxu1 %vm1011_vm3, %v1604_v3 }
 0xf6c   : > { %2628 = vmatpush3.bf16.msra.mxu1 %v1722_v4  ;;  %2629 = vmatprep.mubr.msk.bf16.mxu1 %vm3584_vm1, %v3583_v8 }
 0xf6d   : > { %2641 = vmatprep.subr.bf16.mxu1 %v3583_v8 }
 0xf70   : > { %v2934_v5 = vpop.eup %2933 }
 0xf71   : > { %v1712_v6 = vsel %vm1011_vm3, %v2934_v5, 0.0  ;;  %v1715_v7 = vpack.c.bf16 %v2934_v5, %v2934_v5 }
 0xf72   : > { %1713 = vadd.xlane.f32.xlu0 %v1712_v6 }
 0xf73   : > { %2630 = vmatmul.mubr.msk.bf16.vlgmr.msra.gmra.mrb[20].mxu1 %vm1011_vm3, %v1715_v7 }
 0xf74   : > { %2645 = vmatprep.mubr.msk.bf16.mxu1 %vm3584_vm1, %v3583_v8  ;;  %2642 = vmatpush3.bf16.msra.mxu1 %v2907_v44 }
 0xf75   : > { %2643 = vmatprep.subr.bf16.mxu1 %v3583_v8 }
 0xf78   : > { %2644 = vmatpush3.bf16.msra.mxu1 %v2908_v45 }
 0xf79   : > { %2661 = vmatprep.subr.bf16.mxu1 %v3583_v8 }
 0xff7   : > { %v1603_v24 = vpop.xlane.xlu1 %1602 }
 0xfff   : > { %v1714_v11 = vpop.xlane.xlu0 %1713 }
0x1000   : > { %2935 = vrcp.f32 %v1714_v11  ;;  %v2478_v11 = vld [vmem:[#allocation23 + $0x1] ss:$0 sm:$0xff] }
0x1001   : > { %2937 = vrcp.f32 %v1603_v24 }
0x100a   : > { %v2936_v16 = vpop.eup %2935 }
0x100b   : > { %v2938_v25 = vpop.eup %2937 }
0x103e   : > { %v1647_v12 = vpop.f32.mrb[16].mxu1 }
0x103f   : > { %v2619_v13 = vpop.f32.mrb[17].mxu1  ;;  %v1654_v26 = vmul.f32 %v2938_v25, %v1647_v12  ;;  %v2913_v25 = vld [vmem:[#allocation28] sm:$0xff]  }
0x1040   : > { %v1650_v14 = vpop.f32.mrb[18].mxu1 }
0x1041   : > { %v2620_v15 = vpop.f32.mrb[19].mxu1  ;;  %v1655_v27 = vpack.c.bf16 %v1654_v26, %v1654_v26  ;;  %v2914_v26 = vld [vmem:[#allocation28 + $0x8] sm:$0xff]  }
0x1046   : > { %v1758_v17 = vpop.f32.mrb[20].mxu1 }
0x1047   : > { %v1765_v19 = vmul.f32 %v2936_v16, %v1758_v17  ;;  %v2631_v20 = vpop.f32.mrb[21].mxu1 }
0x1048   : > { %v1761_v21 = vpop.f32.mrb[22].mxu1 }
0x1049   : > { %v1766_v22 = vpack.c.bf16 %v1765_v19, %v1765_v19  ;;  %v2632_v23 = vpop.f32.mrb[23].mxu1 }
0x104b   : > { %1768 = vrot.lane.b32.xlu0 %v1766_v22, %s3590_s20 }
0x10bd   : > { %v1769_v28 = vpop.permute.xlu0 %1768 }
0x10be   : > { %v1772_v29 = vsel %vm964_vm2, %v1655_v27, %v1769_v28 }
0x10bf   : > { %2638 = vmatmul.mubr.msk.bf16.vlgmr.msra.gmra.mrb[28].mxu0 %vm855_vm0, %v1772_v29 }
0x10c0   : > { %2657 = vmatprep.mubr.msk.bf16.mxu0 %vm3584_vm1, %v3583_v8  ;;  %2650 = vmatpush3.bf16.msra.mxu0 %v2909_v55 }
0x10c1   : > { %2651 = vmatprep.subr.bf16.mxu0 %v3583_v8 }
0x10c4   : > { %2652 = vmatpush3.bf16.msra.mxu0 %v2910_v56 }
0x10c5   : > { %2653 = vmatprep.subr.bf16.mxu0 %v3583_v8 }
0x10c8   : > { %2654 = vmatpush3.bf16.msra.mxu0 %v2911_v57 }
0x10c9   : > { %2655 = vmatprep.subr.bf16.mxu0 %v3583_v8 }
0x10cc   : > { %2656 = vmatpush3.bf16.msra.mxu0 %v2912_v58 }
0x1192   : > { %v1834_v32 = vpop.f32.mrb[28].mxu0 }
0x1193   : > { %v1835_v33 = vadd.f32 %v2468_v30, %v1834_v32  ;;  %v2639_v34 = vpop.f32.mrb[29].mxu0  ;;  %v2484_v32 = vld [vmem:[#allocation25 + $0x1] ss:$0 sm:$0xff] }
0x1194   : > { %v1837_v35 = vpop.f32.mrb[30].mxu0  ;;  %v2485_v34 = vld [vmem:[#allocation26 + $0x1] ss:$0 sm:$0xff] }
0x1195   : > { %v2640_v36 = vpop.f32.mrb[31].mxu0  ;;  %v1840_v37 = vadd.f32 %v1835_v33, %v4323_v31 }
0x1197   : > { %v1845_v39 = vsel %vm855_vm0, %v1840_v37, 0.0 }
0x1198   : > { %1846 = vadd.xlane.f32.xlu1 %v1845_v39  ;;  %v2486_v39 = vld [vmem:[#allocation29] ss:$0 sm:$0xff] }
0x1225   : > { %v1847_v40 = vpop.xlane.xlu1 %1846 }
0x1226   : > { %v1848_v41 = vmul.f32 0.03125, %v1847_v40 }
0x1228   : > { %v1849_v18 = vsub.f32 %v1840_v37, %v1848_v41 }
0x122a   : > { %v1850_v42 = vmul.f32 %v1849_v18, %v1849_v18 }
0x122c   : > { %v1851_v43 = vsel %vm855_vm0, %v1850_v42, 0.0 }
0x122d   : > { %1852 = vadd.xlane.f32.xlu0 %v1851_v43 }
0x12ba   : > { %v1853_v46 = vpop.xlane.xlu0 %1852 }
0x12bb   : > { %v1854_v31 = vmul.f32 0.03125, %v1853_v46 }
0x12bd   : > { %v1855_v47 = vadd.f32 1e-12, %v1854_v31 }
0x12bf   : > { %2939 = vrsqrt.f32 %v1855_v47 }
0x12c9   : > { %v2940_v48 = vpop.eup %2939 }
0x12ca   : > { %v1857_v50 = vmul.f32 %v2940_v48, %v1849_v18 }
0x12cc   : > { %v1864_v52 = vmul.f32 %v2472_v49, %v1857_v50 }
0x12ce   : > { %v1871_v53 = vadd.f32 %v2473_v51, %v1864_v52 }
0x12d0   : > { %v1872_v54 = vpack.c.bf16 %v1871_v53, %v1871_v53 }
0x12d2   : > { %2646 = vmatmul.mubr.msk.bf16.vlgmr.msra.gmra.mrb[24].mxu1 %vm855_vm0, %v1872_v54 }
0x12d3   : > { %2665 = vmatprep.mubr.msk.bf16.mxu1 %vm3584_vm1, %v3583_v8  ;;  %2662 = vmatpush3.bf16.msra.mxu1 %v2913_v25 }
0x12d4   : > { %2663 = vmatprep.subr.bf16.mxu1 %v3583_v8 }
0x12d7   : > { %2664 = vmatpush3.bf16.msra.mxu1 %v2914_v26 }
0x13a5   : > { %v1935_v60 = vpop.f32.mrb[24].mxu1 }
0x13a6   : > { %v1936_v61 = vadd.f32 %v2474_v59, %v1935_v60  ;;  %v2647_v38 = vpop.f32.mrb[25].mxu1 }
0x13a7   : > { %v1938_v62 = vpop.f32.mrb[26].mxu1 }
0x13a8   : > { %v1942_v63 = vmul.f32 0.044715, %v1936_v61  ;;  %v2648_v0 = vpop.f32.mrb[27].mxu1  ;;  %v1941_v6 = vmul.f32 0.5, %v1936_v61 }
0x13aa   : > { %v1943_v1 = vmul.f32 %v1942_v63, %v1936_v61 }
0x13ac   : > { %v1944_v2 = vmul.f32 %v1943_v1, %v1936_v61 }
0x13ae   : > { %v1945_v3 = vadd.f32 %v1944_v2, %v1936_v61 }
0x13b0   : > { %v1946_v4 = vmul.f32 0.7978846, %v1945_v3 }
0x13b2   : > { %2941 = vtanh.f32 %v1946_v4 }
0x13bc   : > { %v2942_v5 = vpop.eup %2941 }
0x13bd   : > { %v1948_v7 = vadd.f32 1.0, %v2942_v5 }
0x13bf   : > { %v1949_v9 = vmul.f32 %v1948_v7, %v1941_v6 }
0x13c1   : > { %v1950_v10 = vpack.c.bf16 %v1949_v9, %v1949_v9 }
0x13c3   : > { %2658 = vmatmul.mubr.msk.bf16.vlgmr.msra.gmra.mrb[32].mxu0 %vm1402_vm5, %v1950_v10 }
0x1496   : > { %v2029_v12 = vpop.f32.mrb[32].mxu0 }
0x1497   : > { %v2030_v13 = vadd.f32 %v2478_v11, %v2029_v12  ;;  %v2659_v14 = vpop.f32.mrb[33].mxu0 }
0x1498   : > { %v2032_v15 = vpop.f32.mrb[34].mxu0 }
0x1499   : > { %v2660_v16 = vpop.f32.mrb[35].mxu0  ;;  %v2035_v17 = vadd.f32 %v2030_v13, %v1871_v53 }
0x149b   : > { %v2040_v19 = vsel %vm855_vm0, %v2035_v17, 0.0 }
0x149c   : > { %2041 = vadd.xlane.f32.xlu1 %v2040_v19 }
0x1529   : > { %v2042_v20 = vpop.xlane.xlu1 %2041 }
0x152a   : > { %v2043_v21 = vmul.f32 0.03125, %v2042_v20 }
0x152c   : > { %v2044_v22 = vsub.f32 %v2035_v17, %v2043_v21 }
0x152e   : > { %v2045_v23 = vmul.f32 %v2044_v22, %v2044_v22 }
0x1530   : > { %v2046_v24 = vsel %vm855_vm0, %v2045_v23, 0.0 }
0x1531   : > { %2047 = vadd.xlane.f32.xlu1 %v2046_v24 }
0x15be   : > { %v2048_v27 = vpop.xlane.xlu1 %2047 }
0x15bf   : > { %v2049_v28 = vmul.f32 0.03125, %v2048_v27 }
0x15c1   : > { %v2050_v29 = vadd.f32 1e-12, %v2049_v28 }
0x15c3   : > { %2943 = vrsqrt.f32 %v2050_v29 }
0x15cd   : > { %v2944_v30 = vpop.eup %2943 }
0x15ce   : > { %v2052_v33 = vmul.f32 %v2944_v30, %v2044_v22 }
0x15d0   : > { %v2059_v35 = vmul.f32 %v2484_v32, %v2052_v33 }
0x15d2   : > { %v2066_v36 = vadd.f32 %v2485_v34, %v2059_v35 }
0x15d4   : > { %v2067_v37 = vpack.c.bf16 %v2066_v36, %v2066_v36 }
0x15d6   : > { %2666 = vmatmul.mubr.msk.bf16.vlgmr.msra.gmra.mrb[28].mxu1 %vm855_vm0, %v2067_v37 }
0x16a9   : > { %v2128_v8 = vpop.f32.mrb[28].mxu1 }
0x16aa   : > { %v2129_v40 = vadd.f32 %v2486_v39, %v2128_v8  ;;  %v2667_v41 = vpop.f32.mrb[29].mxu1 }
0x16ab   : > { %v2131_v18 = vpop.f32.mrb[30].mxu1 }
0x16ac   : > { %2134 = vst [vmem:[%s850_s29] sm:$0xff] %v2129_v40  ;;  %v2668_v42 = vpop.f32.mrb[31].mxu1 }
0x16ad   : > { %3466 = shalt.err (!%p3463_p7)
}
0x16ae   : > { %s3467_s5 = scalar_lea.hbm %s4390_s19, 128  ;;  %s3471_s8 = scalar_lea.hbm %s4547_s3, 256 }
0x16af   : > { %p3468_p3 = scmp.ne.s32.totalorder %s4390_s19, %s3467_s5  ;;  %p3472_p8 = scmp.lt.u32.totalorder %s4390_s19, %s4547_s3 }
0x16b0   : > { %p3473_p9 = scmp.lt.u32.totalorder %s3471_s8, %s3467_s5  ;;  %p3475_p1 = scmp.lt.u32.totalorder %s3467_s5, %s4390_s19 }
0x16b1   : > { %p3469_p6 = pnand %p3468_p3, %p4548_p13 }
0x16b2   : > { %p3474_p4 = por %p3473_p9, %p3472_p8 }
0x16b3   : > { %p3470_p12 = pneg %p3469_p6 }
0x16b4   : > { %p3476_p0 = por %p3475_p1, %p3474_p4 }
0x16b6   : > { %p3477_p2 = pnand %p3476_p0, %p3470_p12 }
0x16b8   : > { %3480 = shalt.err (!%p3477_p2)
}
0x16b9   : > { %2737 = dma.vmem_to_hbm [thread:$0]  (%p4548_p13), %s4392_s4, 128, %s4390_s19, %s2136_s24  }
0x16ba PF: > { %s4549_s2 = sld [smem:[#allocation44_spill]]  ;;  %s4550_s28 = sld [smem:[#allocation47_spill]] }
0x16bb   : > { %p4551_p10 = scmp.ne.s32.totalorder %s4518_s17, 0 }
0x16c0   : > { %s2161_s26 = sand.u32 1, %s4549_s2   ;;  %p4552_p11 = scmp.ge.s32.totalorder %s4550_s28, 2 }
0x16c1   : > { %s2162_s25 = scalar_lea.sflag [#allocation4], %s2161_s26 }
0x16c2   : > { %p2796_p5 = pnand %p4552_p11, %p4551_p10 }
0x16c4   : > { %3542 = dma.done.wait (!%p2796_p5), %s2162_s25, 128  }
0x16c5   : > { %3544 = vsyncadd (!%p2796_p5), %s2162_s25, 4294967168  ;;  %s4553_s27 = sld [smem:[#allocation45_spill]]  ;;  %s4554_s28 = sld [smem:[#allocation46_spill]] }
0x16c6   : > { %p42_p7 = scmp.ge.s32.totalorder %s4084_s30, 4   ;;  %s4555_s29 = smov %s4095_s18 }
0x16c8   :  { %44 = sbr.rel (!%p42_p7) target bundleno = 27 (0x1b), region = 226 }
0x16cf   :  { %2167 = vsyncpa [#allocation3], 1 }
0x16d0   :  { %2169 = vsyncpa [#allocation3 + $0x1], 1 }
0x16d1   :  { %2170 = vsyncpa [#allocation6], 1 }
0x16d2   :  { %2172 = vsyncpa [#allocation6 + $0x1], 1 }
0x16d3   :  { %2173 = vsyncpa [#allocation9], 1 }
0x16d4   :  { %2174 = vsyncpa [#allocation12], 1 }
0x16d5   :  { %2175 = vsyncpa [#allocation15], 1 }
0x16d6   :  { %2176 = vsyncpa [#allocation18], 1 }
0x16d7   :  { %2177 = vsyncpa [#allocation21], 1 }
0x16d8   :  { %2178 = vsyncpa [#allocation24], 1 }
0x16d9   :  { %2179 = vsyncpa [#allocation27], 1 }
0x16da   :  { %2180 = vsyncpa [#allocation30], 1 }
0x16db   :  { %2181 = vsyncpa [#allocation4], 1 }
0x16dc   :  { %2183 = vsyncpa [#allocation4 + $0x1], 1 }

</bundles_post_ra>
